<compile_context>
chip_gen: v6e
topology: v6e:2x2x1
jax: 0.10.0
libtpu: 0.0.40
codegen_flags: <defaults>
</compile_context>

<pallas_src>
import functools

import jax
import jax.numpy as jnp
from jax.experimental import pallas as pl
from jax.experimental.pallas import tpu as pltpu

LN_EPS = 1e-5  # nn.LayerNorm default


def _round_up(x, m):
    return ((x + m - 1) // m) * m


def _ln_poolsum(x):
    """x: (C, N) channel-major tile.

    Per spatial position n: LayerNorm over C (biased variance, no affine -- the
    affine is folded into the FC by the wrapper).  Returns the SUM over the N
    positions of the normalized values as a (C, 1) column; the caller applies
    the 1/N_total of the average pool.

    Algebraic form (perf feedback): the normalized tile is never materialized,
        sum_n (x[c,n]-mu[n])*rstd[n] = (x @ rstd)[c] - sum_n mu[n]*rstd[n]
    Zero-padded columns (x = 0 -> mu = 0) contribute exactly 0, so wrapper-side
    spatial zero-padding needs no in-kernel masking.
    """
    x = x.astype(jnp.float32)
    c = x.shape[0]
    s = jnp.sum(x, axis=0, keepdims=True)          # (1, N) sublane reduce
    sq = jnp.sum(x * x, axis=0, keepdims=True)     # (1, N)
    mu = s * (1.0 / c)
    var = sq * (1.0 / c) - mu * mu                 # one-pass (biased) variance, f32
    rstd = jax.lax.rsqrt(var + LN_EPS)             # EUP
    # (C, N) x (1, N) -> (C, 1): spatial reduction on the otherwise-idle MXU.
    pooled = jax.lax.dot_general(x, rstd, (((1,), (1,)), ((), ())),
                                 preferred_element_type=jnp.float32)
    corr = jnp.sum(mu * rstd, axis=1, keepdims=True)   # (1, 1) lane reduce
    return pooled - corr


def _segformer_cls_kernel(x1_ref, x2_ref, x3_ref, x4_ref, w_ref, b_ref,
                          out_ref, acc1_ref, *, n1_total, c_pad_extra):
    t = pl.program_id(1)

    @pl.when(t == 0)
    def _init():
        acc1_ref[...] = jnp.zeros_like(acc1_ref)

    # Streamed stage-1 tile: accumulate the summed normalized channels.
    acc1_ref[...] += _ln_poolsum(x1_ref[...])

    @pl.when(t == pl.num_programs(1) - 1)
    def _finalize():
        p1 = acc1_ref[...] * (1.0 / n1_total)                    # (C1, 1)
        p2 = _ln_poolsum(x2_ref[...]) * (1.0 / x2_ref.shape[1])  # (C2, 1)
        p3 = _ln_poolsum(x3_ref[...]) * (1.0 / x3_ref.shape[1])  # (C3, 1)
        p4 = _ln_poolsum(x4_ref[...]) * (1.0 / x4_ref.shape[1])  # (C4, 1)
        cols = [p1, p2, p3, p4]
        if c_pad_extra:
            cols.append(jnp.zeros((c_pad_extra, 1), jnp.float32))
        pooled = jnp.concatenate(cols, axis=0)                   # (Cpad, 1)
        # Lane-dense logits row: contract pooled's dim 0 against the
        # un-transposed weight -> (1, Kpad); no 1-lane masked store.
        logits = jax.lax.dot_general(pooled, w_ref[...],
                                     (((0,), (0,)), ((), ())),
                                     preferred_element_type=jnp.float32)
        out_ref[...] = (logits + b_ref[...]).astype(out_ref.dtype)


def _vmem_capacity_bytes():
    try:
        return int(pltpu.get_tpu_info().vmem_capacity_bytes)
    except Exception:
        return 64 * 1024 * 1024            # conservative: v7x per-core VMEM


def _default_budgets():
    """(stage-1 block budget, vmem_limit_bytes), per chip generation."""
    if _vmem_capacity_bytes() >= 100 * 1024 * 1024:   # v5e / v6e: 128 MiB VMEM
        return 16 * 1024 * 1024, 96 * 1024 * 1024
    return 4 * 1024 * 1024, 32 * 1024 * 1024          # v7x: 64 MiB physical


def _pick_tile_n(n, c, itemsize, budget_bytes):
    """Largest multiple-of-128 stage-1 spatial tile whose double-buffered
    (C1, tile) block fits in budget_bytes; never exceeds round_up(n, 128)."""
    cap = _round_up(n, 128)
    by_budget = (budget_bytes // max(2 * c * itemsize, 1)) // 128 * 128
    return max(128, min(cap, by_budget))


def segformer_classifier(features_nchw, params, num_classes, *,
                         tile_n1=None,
                         x1_block_budget_bytes=None,
                         vmem_limit_bytes=None,
                         feature_dtype=None,
                         single_buffer_params=True):
    """features_nchw: list of 4 arrays (B, C_i, H_i, W_i), f32 or bf16.
    Returns (B, num_classes) float32 logits."""
    if x1_block_budget_bytes is None or vmem_limit_bytes is None:
        budget, limit = _default_budgets()
        x1_block_budget_bytes = x1_block_budget_bytes or budget
        vmem_limit_bytes = vmem_limit_bytes or limit

    # Optional dtype override.  NOTE: a wrapper-side cast is only a bandwidth
    # win if it fuses with the producer -- prefer feeding bf16 features
    # directly from the caller (as the demo below does).
    if feature_dtype is not None:
        features_nchw = [f.astype(feature_dtype) for f in features_nchw]

    B = features_nchw[0].shape[0]

    # NCHW -> (B, C, H*W): free reshape, channels stay channel-major (no NHWC
    # transpose pass in front of a memory-bound kernel).
    xs = [f.reshape(f.shape[0], f.shape[1], f.shape[2] * f.shape[3])
          for f in features_nchw]
    cs = [x.shape[1] for x in xs]
    ns = [x.shape[2] for x in xs]
    sum_c = sum(cs)

    # ---- fold the LayerNorm affine into the FC (one-time parameter prep) ----
    w_full = jnp.concatenate(
        [w.astype(jnp.float32) for w in params["fc_w_splits"]], axis=0)   # (sum_c, K)
    g_cat = jnp.concatenate(
        [g.reshape(-1).astype(jnp.float32) for g in params["gammas"]], axis=0)
    beta_cat = jnp.concatenate(
        [b.reshape(1, -1).astype(jnp.float32) for b in params["betas"]], axis=1)
    w_eff = w_full * g_cat[:, None]                                       # diag(gamma) @ W
    b_eff = params["fc_b"].reshape(1, -1).astype(jnp.float32) + beta_cat @ w_full

    # Pad classes to 128 lanes and channels to a multiple of 128.  Weight stays
    # un-transposed (Cpad, Kpad) so the finalize writes a lane-dense row.
    k_pad = _round_up(num_classes, 128)
    c_pad = _round_up(sum_c, 128)
    w_pad = jnp.zeros((c_pad, k_pad), jnp.float32)
    w_pad = w_pad.at[:sum_c, :num_classes].set(w_eff)
    b_row = jnp.zeros((1, k_pad), jnp.float32)
    b_row = b_row.at[0, :num_classes].set(b_eff.reshape(-1))

    # ---- stage-1 spatial tiling (robust to N1 % 128 != 0) ----
    n1 = ns[0]
    if tile_n1 is not None:
        tn1 = min(_round_up(max(int(tile_n1), 1), 128), _round_up(n1, 128))
    else:
        tn1 = _pick_tile_n(n1, cs[0], xs[0].dtype.itemsize, x1_block_budget_bytes)
    n1_padded = _round_up(n1, tn1)
    x1 = xs[0]
    if n1_padded != n1:
        # Zero columns contribute exactly 0 to the pooled sum (see _ln_poolsum),
        # so no masking is needed; the divisor below stays the true N1.
        x1 = jnp.pad(x1, ((0, 0), (0, 0), (0, n1_padded - n1)))
    n_tiles = n1_padded // tn1

    kernel = functools.partial(
        _segformer_cls_kernel, n1_total=n1, c_pad_extra=c_pad - sum_c)

    def make_call(use_single_buffer_params):
        param_mode = {}
        if use_single_buffer_params:
            # Grid-invariant blocks: a second pipeline buffer buys nothing; the
            # reclaimed VMEM goes to larger stage-1 tiles (matters on v7x).
            param_mode = dict(pipeline_mode=pl.Buffered(1))
        in_specs = [
            # Stage 1: streamed over its (padded) spatial axis.
            pl.BlockSpec((None, cs[0], tn1), lambda b, t: (b, 0, t)),
            # Stages 2-4: small; constant block index along t -> DMA'd once per
            # batch element and kept VMEM-resident.
            pl.BlockSpec((None, cs[1], ns[1]), lambda b, t: (b, 0, 0)),
            pl.BlockSpec((None, cs[2], ns[2]), lambda b, t: (b, 0, 0)),
            pl.BlockSpec((None, cs[3], ns[3]), lambda b, t: (b, 0, 0)),
            # Folded FC weight + bias row: fully resident parameters.
            pl.BlockSpec((c_pad, k_pad), lambda b, t: (0, 0), **param_mode),
            pl.BlockSpec((1, k_pad), lambda b, t: (0, 0), **param_mode),
        ]
        out_spec = pl.BlockSpec((None, 1, k_pad), lambda b, t: (b, 0, 0))
        return pl.pallas_call(
            kernel,
            out_shape=jax.ShapeDtypeStruct((B, 1, k_pad), jnp.float32),
            grid_spec=pltpu.PrefetchScalarGridSpec(
                num_scalar_prefetch=0,
                grid=(B, n_tiles),
                in_specs=in_specs,
                out_specs=out_spec,
                scratch_shapes=[pltpu.VMEM((cs[0], 1), jnp.float32)],
            ),
            compiler_params=pltpu.CompilerParams(
                dimension_semantics=("parallel", "arbitrary"),
                vmem_limit_bytes=vmem_limit_bytes,
            ),
        )

    args = (x1, xs[1], xs[2], xs[3], w_pad, b_row)
    # TODO(synk): for B == 1 on v7x, split the stage-1 tile range across the two
    # TensorCores (per-core partial accumulators + a tiny combine) instead of
    # parallelizing over batch only.
    if single_buffer_params:
        try:
            out = make_call(True)(*args)
        except Exception:
            # Older JAX without BlockSpec pipeline_mode / Buffered(1) support.
            out = make_call(False)(*args)
    else:
        out = make_call(False)(*args)

    return out[:, 0, :num_classes]


def reference(features_nchw, params, num_classes):
    """Pure-JAX reference mirroring the PyTorch forward (f32 math)."""
    pooled = []
    for i, f in enumerate(features_nchw):
        Bb, C, H, W = f.shape
        x = jnp.transpose(f.astype(jnp.float32), (0, 2, 3, 1)).reshape(Bb, H * W, C)
        mu = jnp.mean(x, axis=-1, keepdims=True)
        var = jnp.mean(jnp.square(x - mu), axis=-1, keepdims=True)
        xn = (x - mu) / jnp.sqrt(var + LN_EPS)
        y = (xn * params["gammas"][i].astype(jnp.float32)
             + params["betas"][i].astype(jnp.float32))
        pooled.append(jnp.mean(y, axis=1))
    feat = jnp.concatenate(pooled, axis=-1)
    w = jnp.concatenate([w.astype(jnp.float32) for w in params["fc_w_splits"]], axis=0)
    return feat @ w + params["fc_b"].astype(jnp.float32)


if __name__ == "__main__":
    B = 2
    embed_dims = (8, 16, 32, 64)
    spatials = (16, 8, 4, 2)     # H_i = W_i -> N_i = (256, 64, 16, 4)
    num_classes = 10

    root = jax.random.PRNGKey(0)
    keys = jax.random.split(root, 13)

    # Caller contract (perf feedback): features arrive as bf16 -- halves HBM
    # traffic on the bandwidth-bound v5e/v6e.  All statistics stay f32 in-kernel.
    features = [
        jax.random.normal(keys[i], (B, embed_dims[i], spatials[i], spatials[i]),
                          dtype=jnp.float32).astype(jnp.bfloat16)
        for i in range(4)
    ]

    # Deterministic synthetic parameters (not a checkpoint load).
    gammas = [1.0 + 0.1 * jax.random.normal(keys[4 + i], (1, embed_dims[i]), jnp.float32)
              for i in range(4)]
    betas = [0.1 * jax.random.normal(keys[8 + i], (1, embed_dims[i]), jnp.float32)
             for i in range(4)]
    sum_c = sum(embed_dims)
    fc_w = jax.random.normal(keys[12], (sum_c, num_classes), jnp.float32) / jnp.sqrt(sum_c)
    fc_b = jnp.linspace(-0.5, 0.5, num_classes, dtype=jnp.float32).reshape(1, num_classes)
    splits, off = [], 0
    for c in embed_dims:
        splits.append(fc_w[off:off + c, :])
        off += c

    params = {"gammas": gammas, "betas": betas, "fc_w_splits": splits, "fc_b": fc_b}

    # tile_n1=128 -> 2 stage-1 tiles per batch element: exercises the streamed
    # accumulator + pl.when finalize path (the auto-picker would take 1 tile).
    out = segformer_classifier(features, params, num_classes, tile_n1=128)
    out = jax.block_until_ready(out)

    ref = jax.block_until_ready(reference(features, params, num_classes))
    assert out.shape == (B, num_classes), out.shape
    assert jnp.allclose(out, ref, atol=5e-4, rtol=5e-4), (out, ref)

    print("KERNEL_OK")
</pallas_src>

<mosaic_0001>
module attributes {stable_mosaic.version = 11 : i64} {
  func.func @_segformer_cls_kernel(%arg0: i32, %arg1: i32, %arg2: memref<1x8x128xbf16, #tpu.memory_space<vmem>>, %arg3: memref<1x16x64xbf16, #tpu.memory_space<vmem>>, %arg4: memref<1x32x16xbf16, #tpu.memory_space<vmem>>, %arg5: memref<1x64x4xbf16, #tpu.memory_space<vmem>>, %arg6: memref<128x128xf32, #tpu.memory_space<vmem>>, %arg7: memref<1x128xf32, #tpu.memory_space<vmem>>, %arg8: memref<1x1x128xf32, #tpu.memory_space<vmem>>, %arg9: memref<8x1xf32, #tpu.memory_space<vmem>>) attributes {dimension_semantics = [#tpu.dimension_semantics<parallel>, #tpu.dimension_semantics<arbitrary>], iteration_bounds = array<i64: 2, 2>, scalar_prefetch = 0 : i64, scratch_operands = 1 : i64, tpu.core_type = #tpu.core_type<tc>, window_params = [{transform_indices = @transform_0, window_bounds = array<i64: 1, 8, 128>}, {transform_indices = @transform_1, window_bounds = array<i64: 1, 16, 64>}, {transform_indices = @transform_2, window_bounds = array<i64: 1, 32, 16>}, {transform_indices = @transform_3, window_bounds = array<i64: 1, 64, 4>}, {pipeline_mode = #tpu.pipeline_mode<synchronous>, transform_indices = @transform_4, window_bounds = array<i64: 128, 128>}, {pipeline_mode = #tpu.pipeline_mode<synchronous>, transform_indices = @transform_5, window_bounds = array<i64: 1, 128>}, {transform_indices = @transform_6, window_bounds = array<i64: 1, 1, 128>}]} {
    %c0_i32 = arith.constant 0 : i32
    %0 = arith.cmpi eq, %arg1, %c0_i32 : i32
    %1 = arith.extui %0 : i1 to i32
    %c0_i32_0 = arith.constant 0 : i32
    %2 = arith.cmpi ne, %1, %c0_i32_0 : i32
    scf.if %2 {
      %cst_14 = arith.constant 0.000000e+00 : f32
      %32 = vector.broadcast %cst_14 : f32 to vector<8x1xf32>
      %c0_15 = arith.constant 0 : index
      %c0_16 = arith.constant 0 : index
      %33 = vector.load %arg9[%c0_15, %c0_16] : memref<8x1xf32, #tpu.memory_space<vmem>>, vector<8x1xf32>
      tpu.vector_store %arg9[%c0_15, %c0_16], %32 {strides = array<i32>} : memref<8x1xf32, #tpu.memory_space<vmem>>, vector<8x1xf32>,
    } else {
    }
    %c0 = arith.constant 0 : index
    %c0_1 = arith.constant 0 : index
    %3 = vector.load %arg9[%c0, %c0_1] : memref<8x1xf32, #tpu.memory_space<vmem>>, vector<8x1xf32>
    %c0_2 = arith.constant 0 : index
    %c0_3 = arith.constant 0 : index
    %c0_4 = arith.constant 0 : index
    %4 = vector.load %arg2[%c0_2, %c0_3, %c0_4] : memref<1x8x128xbf16, #tpu.memory_space<vmem>>, vector<1x8x128xbf16>
    %5 = vector.shape_cast %4 : vector<1x8x128xbf16> to vector<8x128xbf16>
    %6 = arith.extf %5 : vector<8x128xbf16> to vector<8x128xf32>
    %cst = arith.constant dense<0.000000e+00> : vector<128xf32>
    %7 = vector.multi_reduction <add>, %6, %cst [0] : vector<8x128xf32> to vector<128xf32>
    %8 = vector.shape_cast %7 : vector<128xf32> to vector<1x128xf32>
    %9 = arith.mulf %6, %6 : vector<8x128xf32>
    %cst_5 = arith.constant dense<0.000000e+00> : vector<128xf32>
    %10 = vector.multi_reduction <add>, %9, %cst_5 [0] : vector<8x128xf32> to vector<128xf32>
    %11 = vector.shape_cast %10 : vector<128xf32> to vector<1x128xf32>
    %cst_6 = arith.constant 1.250000e-01 : f32
    %12 = vector.broadcast %cst_6 : f32 to vector<1x128xf32>
    %13 = arith.mulf %8, %12 : vector<1x128xf32>
    %cst_7 = arith.constant 1.250000e-01 : f32
    %14 = vector.broadcast %cst_7 : f32 to vector<1x128xf32>
    %15 = arith.mulf %11, %14 : vector<1x128xf32>
    %16 = arith.mulf %13, %13 : vector<1x128xf32>
    %17 = arith.subf %15, %16 : vector<1x128xf32>
    %cst_8 = arith.constant 9.99999974E-6 : f32
    %18 = vector.broadcast %cst_8 : f32 to vector<1x128xf32>
    %19 = arith.addf %17, %18 : vector<1x128xf32>
    %20 = math.rsqrt %19 : vector<1x128xf32>
    %cst_9 = arith.constant dense<0.000000e+00> : vector<8x1xf32>
    %21 = tpu.matmul %6, %20, %cst_9 {dimension_numbers = #tpu.dot_dimension_numbers<[1], [1], [0], [0], [0, 0, 1, 0], [], []>} : vector<8x128xf32>, vector<1x128xf32>, vector<8x1xf32> -> vector<8x1xf32>
    %22 = arith.mulf %13, %20 : vector<1x128xf32>
    %cst_10 = arith.constant dense<0.000000e+00> : vector<1xf32>
    %23 = vector.multi_reduction <add>, %22, %cst_10 [1] : vector<1x128xf32> to vector<1xf32>
    %24 = vector.shape_cast %23 : vector<1xf32> to vector<1x1xf32>
    %25 = vector.broadcast %24 : vector<1x1xf32> to vector<8x1xf32>
    %26 = arith.subf %21, %25 : vector<8x1xf32>
    %27 = arith.addf %3, %26 : vector<8x1xf32>
    %c0_11 = arith.constant 0 : index
    %c0_12 = arith.constant 0 : index
    %28 = vector.load %arg9[%c0_11, %c0_12] : memref<8x1xf32, #tpu.memory_space<vmem>>, vector<8x1xf32>
    tpu.vector_store %arg9[%c0_11, %c0_12], %27 {strides = array<i32>} : memref<8x1xf32, #tpu.memory_space<vmem>>, vector<8x1xf32>,
    %c1_i32 = arith.constant 1 : i32
    %29 = arith.cmpi eq, %arg1, %c1_i32 : i32
    %30 = arith.extui %29 : i1 to i32
    %c0_i32_13 = arith.constant 0 : i32
    %31 = arith.cmpi ne, %30, %c0_i32_13 : i32
    scf.if %31 {
      %c0_14 = arith.constant 0 : index
      %c0_15 = arith.constant 0 : index
      %32 = vector.load %arg9[%c0_14, %c0_15] : memref<8x1xf32, #tpu.memory_space<vmem>>, vector<8x1xf32>
      %cst_16 = arith.constant 3.906250e-03 : f32
      %33 = vector.broadcast %cst_16 : f32 to vector<8x1xf32>
      %34 = arith.mulf %32, %33 : vector<8x1xf32>
      %c0_17 = arith.constant 0 : index
      %c0_18 = arith.constant 0 : index
      %c0_19 = arith.constant 0 : index
      %35 = vector.load %arg3[%c0_17, %c0_18, %c0_19] : memref<1x16x64xbf16, #tpu.memory_space<vmem>>, vector<1x16x64xbf16>
      %36 = vector.shape_cast %35 : vector<1x16x64xbf16> to vector<16x64xbf16>
      %37 = arith.extf %36 : vector<16x64xbf16> to vector<16x64xf32>
      %cst_20 = arith.constant dense<0.000000e+00> : vector<64xf32>
      %38 = vector.multi_reduction <add>, %37, %cst_20 [0] : vector<16x64xf32> to vector<64xf32>
      %39 = vector.shape_cast %38 : vector<64xf32> to vector<1x64xf32>
      %40 = arith.mulf %37, %37 : vector<16x64xf32>
      %cst_21 = arith.constant dense<0.000000e+00> : vector<64xf32>
      %41 = vector.multi_reduction <add>, %40, %cst_21 [0] : vector<16x64xf32> to vector<64xf32>
      %42 = vector.shape_cast %41 : vector<64xf32> to vector<1x64xf32>
      %cst_22 = arith.constant 6.250000e-02 : f32
      %43 = vector.broadcast %cst_22 : f32 to vector<1x64xf32>
      %44 = arith.mulf %39, %43 : vector<1x64xf32>
      %cst_23 = arith.constant 6.250000e-02 : f32
      %45 = vector.broadcast %cst_23 : f32 to vector<1x64xf32>
      %46 = arith.mulf %42, %45 : vector<1x64xf32>
      %47 = arith.mulf %44, %44 : vector<1x64xf32>
      %48 = arith.subf %46, %47 : vector<1x64xf32>
      %cst_24 = arith.constant 9.99999974E-6 : f32
      %49 = vector.broadcast %cst_24 : f32 to vector<1x64xf32>
      %50 = arith.addf %48, %49 : vector<1x64xf32>
      %51 = math.rsqrt %50 : vector<1x64xf32>
      %cst_25 = arith.constant dense<0.000000e+00> : vector<16x1xf32>
      %52 = tpu.matmul %37, %51, %cst_25 {dimension_numbers = #tpu.dot_dimension_numbers<[1], [1], [0], [0], [0, 0, 1, 0], [], []>} : vector<16x64xf32>, vector<1x64xf32>, vector<16x1xf32> -> vector<16x1xf32>
      %53 = arith.mulf %44, %51 : vector<1x64xf32>
      %cst_26 = arith.constant dense<0.000000e+00> : vector<1xf32>
      %54 = vector.multi_reduction <add>, %53, %cst_26 [1] : vector<1x64xf32> to vector<1xf32>
      %55 = vector.shape_cast %54 : vector<1xf32> to vector<1x1xf32>
      %56 = vector.broadcast %55 : vector<1x1xf32> to vector<16x1xf32>
      %57 = arith.subf %52, %56 : vector<16x1xf32>
      %cst_27 = arith.constant 1.562500e-02 : f32
      %58 = vector.broadcast %cst_27 : f32 to vector<16x1xf32>
      %59 = arith.mulf %57, %58 : vector<16x1xf32>
      %c0_28 = arith.constant 0 : index
      %c0_29 = arith.constant 0 : index
      %c0_30 = arith.constant 0 : index
      %60 = vector.load %arg4[%c0_28, %c0_29, %c0_30] : memref<1x32x16xbf16, #tpu.memory_space<vmem>>, vector<1x32x16xbf16>
      %61 = vector.shape_cast %60 : vector<1x32x16xbf16> to vector<32x16xbf16>
      %62 = arith.extf %61 : vector<32x16xbf16> to vector<32x16xf32>
      %cst_31 = arith.constant dense<0.000000e+00> : vector<16xf32>
      %63 = vector.multi_reduction <add>, %62, %cst_31 [0] : vector<32x16xf32> to vector<16xf32>
      %64 = vector.shape_cast %63 : vector<16xf32> to vector<1x16xf32>
      %65 = arith.mulf %62, %62 : vector<32x16xf32>
      %cst_32 = arith.constant dense<0.000000e+00> : vector<16xf32>
      %66 = vector.multi_reduction <add>, %65, %cst_32 [0] : vector<32x16xf32> to vector<16xf32>
      %67 = vector.shape_cast %66 : vector<16xf32> to vector<1x16xf32>
      %cst_33 = arith.constant 3.125000e-02 : f32
      %68 = vector.broadcast %cst_33 : f32 to vector<1x16xf32>
      %69 = arith.mulf %64, %68 : vector<1x16xf32>
      %cst_34 = arith.constant 3.125000e-02 : f32
      %70 = vector.broadcast %cst_34 : f32 to vector<1x16xf32>
      %71 = arith.mulf %67, %70 : vector<1x16xf32>
      %72 = arith.mulf %69, %69 : vector<1x16xf32>
      %73 = arith.subf %71, %72 : vector<1x16xf32>
      %cst_35 = arith.constant 9.99999974E-6 : f32
      %74 = vector.broadcast %cst_35 : f32 to vector<1x16xf32>
      %75 = arith.addf %73, %74 : vector<1x16xf32>
      %76 = math.rsqrt %75 : vector<1x16xf32>
      %cst_36 = arith.constant dense<0.000000e+00> : vector<32x1xf32>
      %77 = tpu.matmul %62, %76, %cst_36 {dimension_numbers = #tpu.dot_dimension_numbers<[1], [1], [0], [0], [0, 0, 1, 0], [], []>} : vector<32x16xf32>, vector<1x16xf32>, vector<32x1xf32> -> vector<32x1xf32>
      %78 = arith.mulf %69, %76 : vector<1x16xf32>
      %cst_37 = arith.constant dense<0.000000e+00> : vector<1xf32>
      %79 = vector.multi_reduction <add>, %78, %cst_37 [1] : vector<1x16xf32> to vector<1xf32>
      %80 = vector.shape_cast %79 : vector<1xf32> to vector<1x1xf32>
      %81 = vector.broadcast %80 : vector<1x1xf32> to vector<32x1xf32>
      %82 = arith.subf %77, %81 : vector<32x1xf32>
      %cst_38 = arith.constant 6.250000e-02 : f32
      %83 = vector.broadcast %cst_38 : f32 to vector<32x1xf32>
      %84 = arith.mulf %82, %83 : vector<32x1xf32>
      %c0_39 = arith.constant 0 : index
      %c0_40 = arith.constant 0 : index
      %c0_41 = arith.constant 0 : index
      %85 = vector.load %arg5[%c0_39, %c0_40, %c0_41] : memref<1x64x4xbf16, #tpu.memory_space<vmem>>, vector<1x64x4xbf16>
      %86 = vector.shape_cast %85 : vector<1x64x4xbf16> to vector<64x4xbf16>
      %87 = arith.extf %86 : vector<64x4xbf16> to vector<64x4xf32>
      %cst_42 = arith.constant dense<0.000000e+00> : vector<4xf32>
      %88 = vector.multi_reduction <add>, %87, %cst_42 [0] : vector<64x4xf32> to vector<4xf32>
      %89 = vector.shape_cast %88 : vector<4xf32> to vector<1x4xf32>
      %90 = arith.mulf %87, %87 : vector<64x4xf32>
      %cst_43 = arith.constant dense<0.000000e+00> : vector<4xf32>
      %91 = vector.multi_reduction <add>, %90, %cst_43 [0] : vector<64x4xf32> to vector<4xf32>
      %92 = vector.shape_cast %91 : vector<4xf32> to vector<1x4xf32>
      %cst_44 = arith.constant 1.562500e-02 : f32
      %93 = vector.broadcast %cst_44 : f32 to vector<1x4xf32>
      %94 = arith.mulf %89, %93 : vector<1x4xf32>
      %cst_45 = arith.constant 1.562500e-02 : f32
      %95 = vector.broadcast %cst_45 : f32 to vector<1x4xf32>
      %96 = arith.mulf %92, %95 : vector<1x4xf32>
      %97 = arith.mulf %94, %94 : vector<1x4xf32>
      %98 = arith.subf %96, %97 : vector<1x4xf32>
      %cst_46 = arith.constant 9.99999974E-6 : f32
      %99 = vector.broadcast %cst_46 : f32 to vector<1x4xf32>
      %100 = arith.addf %98, %99 : vector<1x4xf32>
      %101 = math.rsqrt %100 : vector<1x4xf32>
      %cst_47 = arith.constant dense<0.000000e+00> : vector<64x1xf32>
      %102 = tpu.matmul %87, %101, %cst_47 {dimension_numbers = #tpu.dot_dimension_numbers<[1], [1], [0], [0], [0, 0, 1, 0], [], []>} : vector<64x4xf32>, vector<1x4xf32>, vector<64x1xf32> -> vector<64x1xf32>
      %103 = arith.mulf %94, %101 : vector<1x4xf32>
      %cst_48 = arith.constant dense<0.000000e+00> : vector<1xf32>
      %104 = vector.multi_reduction <add>, %103, %cst_48 [1] : vector<1x4xf32> to vector<1xf32>
      %105 = vector.shape_cast %104 : vector<1xf32> to vector<1x1xf32>
      %106 = vector.broadcast %105 : vector<1x1xf32> to vector<64x1xf32>
      %107 = arith.subf %102, %106 : vector<64x1xf32>
      %cst_49 = arith.constant 2.500000e-01 : f32
      %108 = vector.broadcast %cst_49 : f32 to vector<64x1xf32>
      %109 = arith.mulf %107, %108 : vector<64x1xf32>
      %cst_50 = arith.constant 0.000000e+00 : f32
      %110 = vector.broadcast %cst_50 : f32 to vector<8x1xf32>
      %111 = tpu.concatenate %34, %59, %84, %109, %110 in 0 : vector<8x1xf32>, vector<16x1xf32>, vector<32x1xf32>, vector<64x1xf32>, vector<8x1xf32> -> vector<128x1xf32>
      %c0_51 = arith.constant 0 : index
      %c0_52 = arith.constant 0 : index
      %112 = vector.load %arg6[%c0_51, %c0_52] : memref<128x128xf32, #tpu.memory_space<vmem>>, vector<128x128xf32>
      %cst_53 = arith.constant dense<0.000000e+00> : vector<1x128xf32>
      %113 = tpu.matmul %111, %112, %cst_53 {dimension_numbers = #tpu.dot_dimension_numbers<[0], [0], [1], [1], [0, 1, 1, 1], [], []>} : vector<128x1xf32>, vector<128x128xf32>, vector<1x128xf32> -> vector<1x128xf32>
      %c0_54 = arith.constant 0 : index
      %c0_55 = arith.constant 0 : index
      %114 = vector.load %arg7[%c0_54, %c0_55] : memref<1x128xf32, #tpu.memory_space<vmem>>, vector<1x128xf32>
      %115 = arith.addf %113, %114 : vector<1x128xf32>
      %c0_56 = arith.constant 0 : index
      %c0_57 = arith.constant 0 : index
      %c0_58 = arith.constant 0 : index
      %116 = vector.load %arg8[%c0_56, %c0_57, %c0_58] : memref<1x1x128xf32, #tpu.memory_space<vmem>>, vector<1x1x128xf32>
      %117 = vector.shape_cast %116 : vector<1x1x128xf32> to vector<1x128xf32>
      %118 = vector.shape_cast %115 : vector<1x128xf32> to vector<1x1x128xf32>
      tpu.vector_store %arg8[%c0_56, %c0_57, %c0_58], %118 {strides = array<i32>} : memref<1x1x128xf32, #tpu.memory_space<vmem>>, vector<1x1x128xf32>,
    } else {
    }
    return
  }
  func.func @transform_0(%arg0: i32, %arg1: i32) -> (i32, i32, i32) {
    %c0_i32 = arith.constant 0 : i32
    %c0_i32_0 = arith.constant 0 : i32
    return %arg0, %c0_i32, %arg1 : i32, i32, i32
  }
  func.func @transform_1(%arg0: i32, %arg1: i32) -> (i32, i32, i32) {
    %c0_i32 = arith.constant 0 : i32
    %c0_i32_0 = arith.constant 0 : i32
    %c0_i32_1 = arith.constant 0 : i32
    return %arg0, %c0_i32, %c0_i32_0 : i32, i32, i32
  }
  func.func @transform_2(%arg0: i32, %arg1: i32) -> (i32, i32, i32) {
    %c0_i32 = arith.constant 0 : i32
    %c0_i32_0 = arith.constant 0 : i32
    %c0_i32_1 = arith.constant 0 : i32
    return %arg0, %c0_i32, %c0_i32_0 : i32, i32, i32
  }
  func.func @transform_3(%arg0: i32, %arg1: i32) -> (i32, i32, i32) {
    %c0_i32 = arith.constant 0 : i32
    %c0_i32_0 = arith.constant 0 : i32
    %c0_i32_1 = arith.constant 0 : i32
    return %arg0, %c0_i32, %c0_i32_0 : i32, i32, i32
  }
  func.func @transform_4(%arg0: i32, %arg1: i32) -> (i32, i32) {
    %c0_i32 = arith.constant 0 : i32
    %c0_i32_0 = arith.constant 0 : i32
    %c0_i32_1 = arith.constant 0 : i32
    return %c0_i32, %c0_i32_0 : i32, i32
  }
  func.func @transform_5(%arg0: i32, %arg1: i32) -> (i32, i32) {
    %c0_i32 = arith.constant 0 : i32
    %c0_i32_0 = arith.constant 0 : i32
    %c0_i32_1 = arith.constant 0 : i32
    return %c0_i32, %c0_i32_0 : i32, i32
  }
  func.func @transform_6(%arg0: i32, %arg1: i32) -> (i32, i32, i32) {
    %c0_i32 = arith.constant 0 : i32
    %c0_i32_0 = arith.constant 0 : i32
    %c0_i32_1 = arith.constant 0 : i32
    return %arg0, %c0_i32, %c0_i32_0 : i32, i32, i32
  }
}

module attributes {stable_mosaic.version = 11 : i64} {
  func.func @_segformer_cls_kernel(%arg0: i32, %arg1: i32, %arg2: memref<1x8x128xbf16, #tpu.memory_space<vmem>>, %arg3: memref<1x16x64xbf16, #tpu.memory_space<vmem>>, %arg4: memref<1x32x16xbf16, #tpu.memory_space<vmem>>, %arg5: memref<1x64x4xbf16, #tpu.memory_space<vmem>>, %arg6: memref<128x128xf32, #tpu.memory_space<vmem>>, %arg7: memref<1x128xf32, #tpu.memory_space<vmem>>, %arg8: memref<1x1x128xf32, #tpu.memory_space<vmem>>, %arg9: memref<8x1xf32, #tpu.memory_space<vmem>>) attributes {dimension_semantics = [#tpu.dimension_semantics<parallel>, #tpu.dimension_semantics<arbitrary>], iteration_bounds = array<i64: 2, 2>, scalar_prefetch = 0 : i64, scratch_operands = 1 : i64, tpu.core_type = #tpu.core_type<tc>, window_params = [{transform_indices = @transform_0, window_bounds = array<i64: 1, 8, 128>}, {transform_indices = @transform_1, window_bounds = array<i64: 1, 16, 64>}, {transform_indices = @transform_2, window_bounds = array<i64: 1, 32, 16>}, {transform_indices = @transform_3, window_bounds = array<i64: 1, 64, 4>}, {pipeline_mode = #tpu.pipeline_mode<synchronous>, transform_indices = @transform_4, window_bounds = array<i64: 128, 128>}, {pipeline_mode = #tpu.pipeline_mode<synchronous>, transform_indices = @transform_5, window_bounds = array<i64: 1, 128>}, {transform_indices = @transform_6, window_bounds = array<i64: 1, 1, 128>}]} {
    %c0_i32 = arith.constant 0 : i32
    %0 = arith.cmpi eq, %arg1, %c0_i32 : i32
    %1 = arith.extui %0 : i1 to i32
    %c0_i32_0 = arith.constant 0 : i32
    %2 = arith.cmpi ne, %1, %c0_i32_0 : i32
    scf.if %2 {
      %cst_14 = arith.constant 0.000000e+00 : f32
      %32 = vector.broadcast %cst_14 : f32 to vector<8x1xf32>
      %c0_15 = arith.constant 0 : index
      %c0_16 = arith.constant 0 : index
      %33 = vector.load %arg9[%c0_15, %c0_16] : memref<8x1xf32, #tpu.memory_space<vmem>>, vector<8x1xf32>
      tpu.vector_store %arg9[%c0_15, %c0_16], %32 {strides = array<i32>} : memref<8x1xf32, #tpu.memory_space<vmem>>, vector<8x1xf32>,
    } else {
    }
    %c0 = arith.constant 0 : index
    %c0_1 = arith.constant 0 : index
    %3 = vector.load %arg9[%c0, %c0_1] : memref<8x1xf32, #tpu.memory_space<vmem>>, vector<8x1xf32>
    %c0_2 = arith.constant 0 : index
    %c0_3 = arith.constant 0 : index
    %c0_4 = arith.constant 0 : index
    %4 = vector.load %arg2[%c0_2, %c0_3, %c0_4] : memref<1x8x128xbf16, #tpu.memory_space<vmem>>, vector<1x8x128xbf16>
    %5 = vector.shape_cast %4 : vector<1x8x128xbf16> to vector<8x128xbf16>
    %6 = arith.extf %5 : vector<8x128xbf16> to vector<8x128xf32>
    %cst = arith.constant dense<0.000000e+00> : vector<128xf32>
    %7 = vector.multi_reduction <add>, %6, %cst [0] : vector<8x128xf32> to vector<128xf32>
    %8 = vector.shape_cast %7 : vector<128xf32> to vector<1x128xf32>
    %9 = arith.mulf %6, %6 : vector<8x128xf32>
    %cst_5 = arith.constant dense<0.000000e+00> : vector<128xf32>
    %10 = vector.multi_reduction <add>, %9, %cst_5 [0] : vector<8x128xf32> to vector<128xf32>
    %11 = vector.shape_cast %10 : vector<128xf32> to vector<1x128xf32>
    %cst_6 = arith.constant 1.250000e-01 : f32
    %12 = vector.broadcast %cst_6 : f32 to vector<1x128xf32>
    %13 = arith.mulf %8, %12 : vector<1x128xf32>
    %cst_7 = arith.constant 1.250000e-01 : f32
    %14 = vector.broadcast %cst_7 : f32 to vector<1x128xf32>
    %15 = arith.mulf %11, %14 : vector<1x128xf32>
    %16 = arith.mulf %13, %13 : vector<1x128xf32>
    %17 = arith.subf %15, %16 : vector<1x128xf32>
    %cst_8 = arith.constant 9.99999974E-6 : f32
    %18 = vector.broadcast %cst_8 : f32 to vector<1x128xf32>
    %19 = arith.addf %17, %18 : vector<1x128xf32>
    %20 = math.rsqrt %19 : vector<1x128xf32>
    %cst_9 = arith.constant dense<0.000000e+00> : vector<8x1xf32>
    %21 = tpu.matmul %6, %20, %cst_9 {dimension_numbers = #tpu.dot_dimension_numbers<[1], [1], [0], [0], [0, 0, 1, 0], [], []>} : vector<8x128xf32>, vector<1x128xf32>, vector<8x1xf32> -> vector<8x1xf32>
    %22 = arith.mulf %13, %20 : vector<1x128xf32>
    %cst_10 = arith.constant dense<0.000000e+00> : vector<1xf32>
    %23 = vector.multi_reduction <add>, %22, %cst_10 [1] : vector<1x128xf32> to vector<1xf32>
    %24 = vector.shape_cast %23 : vector<1xf32> to vector<1x1xf32>
    %25 = vector.broadcast %24 : vector<1x1xf32> to vector<8x1xf32>
    %26 = arith.subf %21, %25 : vector<8x1xf32>
    %27 = arith.addf %3, %26 : vector<8x1xf32>
    %c0_11 = arith.constant 0 : index
    %c0_12 = arith.constant 0 : index
    %28 = vector.load %arg9[%c0_11, %c0_12] : memref<8x1xf32, #tpu.memory_space<vmem>>, vector<8x1xf32>
    tpu.vector_store %arg9[%c0_11, %c0_12], %27 {strides = array<i32>} : memref<8x1xf32, #tpu.memory_space<vmem>>, vector<8x1xf32>,
    %c1_i32 = arith.constant 1 : i32
    %29 = arith.cmpi eq, %arg1, %c1_i32 : i32
    %30 = arith.extui %29 : i1 to i32
    %c0_i32_13 = arith.constant 0 : i32
    %31 = arith.cmpi ne, %30, %c0_i32_13 : i32
    scf.if %31 {
      %c0_14 = arith.constant 0 : index
      %c0_15 = arith.constant 0 : index
      %32 = vector.load %arg9[%c0_14, %c0_15] : memref<8x1xf32, #tpu.memory_space<vmem>>, vector<8x1xf32>
      %cst_16 = arith.constant 3.906250e-03 : f32
      %33 = vector.broadcast %cst_16 : f32 to vector<8x1xf32>
      %34 = arith.mulf %32, %33 : vector<8x1xf32>
      %c0_17 = arith.constant 0 : index
      %c0_18 = arith.constant 0 : index
      %c0_19 = arith.constant 0 : index
      %35 = vector.load %arg3[%c0_17, %c0_18, %c0_19] : memref<1x16x64xbf16, #tpu.memory_space<vmem>>, vector<1x16x64xbf16>
      %36 = vector.shape_cast %35 : vector<1x16x64xbf16> to vector<16x64xbf16>
      %37 = arith.extf %36 : vector<16x64xbf16> to vector<16x64xf32>
      %cst_20 = arith.constant dense<0.000000e+00> : vector<64xf32>
      %38 = vector.multi_reduction <add>, %37, %cst_20 [0] : vector<16x64xf32> to vector<64xf32>
      %39 = vector.shape_cast %38 : vector<64xf32> to vector<1x64xf32>
      %40 = arith.mulf %37, %37 : vector<16x64xf32>
      %cst_21 = arith.constant dense<0.000000e+00> : vector<64xf32>
      %41 = vector.multi_reduction <add>, %40, %cst_21 [0] : vector<16x64xf32> to vector<64xf32>
      %42 = vector.shape_cast %41 : vector<64xf32> to vector<1x64xf32>
      %cst_22 = arith.constant 6.250000e-02 : f32
      %43 = vector.broadcast %cst_22 : f32 to vector<1x64xf32>
      %44 = arith.mulf %39, %43 : vector<1x64xf32>
      %cst_23 = arith.constant 6.250000e-02 : f32
      %45 = vector.broadcast %cst_23 : f32 to vector<1x64xf32>
      %46 = arith.mulf %42, %45 : vector<1x64xf32>
      %47 = arith.mulf %44, %44 : vector<1x64xf32>
      %48 = arith.subf %46, %47 : vector<1x64xf32>
      %cst_24 = arith.constant 9.99999974E-6 : f32
      %49 = vector.broadcast %cst_24 : f32 to vector<1x64xf32>
      %50 = arith.addf %48, %49 : vector<1x64xf32>
      %51 = math.rsqrt %50 : vector<1x64xf32>
      %cst_25 = arith.constant dense<0.000000e+00> : vector<16x1xf32>
      %52 = tpu.matmul %37, %51, %cst_25 {dimension_numbers = #tpu.dot_dimension_numbers<[1], [1], [0], [0], [0, 0, 1, 0], [], []>} : vector<16x64xf32>, vector<1x64xf32>, vector<16x1xf32> -> vector<16x1xf32>
      %53 = arith.mulf %44, %51 : vector<1x64xf32>
      %cst_26 = arith.constant dense<0.000000e+00> : vector<1xf32>
      %54 = vector.multi_reduction <add>, %53, %cst_26 [1] : vector<1x64xf32> to vector<1xf32>
      %55 = vector.shape_cast %54 : vector<1xf32> to vector<1x1xf32>
      %56 = vector.broadcast %55 : vector<1x1xf32> to vector<16x1xf32>
      %57 = arith.subf %52, %56 : vector<16x1xf32>
      %cst_27 = arith.constant 1.562500e-02 : f32
      %58 = vector.broadcast %cst_27 : f32 to vector<16x1xf32>
      %59 = arith.mulf %57, %58 : vector<16x1xf32>
      %c0_28 = arith.constant 0 : index
      %c0_29 = arith.constant 0 : index
      %c0_30 = arith.constant 0 : index
      %60 = vector.load %arg4[%c0_28, %c0_29, %c0_30] : memref<1x32x16xbf16, #tpu.memory_space<vmem>>, vector<1x32x16xbf16>
      %61 = vector.shape_cast %60 : vector<1x32x16xbf16> to vector<32x16xbf16>
      %62 = arith.extf %61 : vector<32x16xbf16> to vector<32x16xf32>
      %cst_31 = arith.constant dense<0.000000e+00> : vector<16xf32>
      %63 = vector.multi_reduction <add>, %62, %cst_31 [0] : vector<32x16xf32> to vector<16xf32>
      %64 = vector.shape_cast %63 : vector<16xf32> to vector<1x16xf32>
      %65 = arith.mulf %62, %62 : vector<32x16xf32>
      %cst_32 = arith.constant dense<0.000000e+00> : vector<16xf32>
      %66 = vector.multi_reduction <add>, %65, %cst_32 [0] : vector<32x16xf32> to vector<16xf32>
      %67 = vector.shape_cast %66 : vector<16xf32> to vector<1x16xf32>
      %cst_33 = arith.constant 3.125000e-02 : f32
      %68 = vector.broadcast %cst_33 : f32 to vector<1x16xf32>
      %69 = arith.mulf %64, %68 : vector<1x16xf32>
      %cst_34 = arith.constant 3.125000e-02 : f32
      %70 = vector.broadcast %cst_34 : f32 to vector<1x16xf32>
      %71 = arith.mulf %67, %70 : vector<1x16xf32>
      %72 = arith.mulf %69, %69 : vector<1x16xf32>
      %73 = arith.subf %71, %72 : vector<1x16xf32>
      %cst_35 = arith.constant 9.99999974E-6 : f32
      %74 = vector.broadcast %cst_35 : f32 to vector<1x16xf32>
      %75 = arith.addf %73, %74 : vector<1x16xf32>
      %76 = math.rsqrt %75 : vector<1x16xf32>
      %cst_36 = arith.constant dense<0.000000e+00> : vector<32x1xf32>
      %77 = tpu.matmul %62, %76, %cst_36 {dimension_numbers = #tpu.dot_dimension_numbers<[1], [1], [0], [0], [0, 0, 1, 0], [], []>} : vector<32x16xf32>, vector<1x16xf32>, vector<32x1xf32> -> vector<32x1xf32>
      %78 = arith.mulf %69, %76 : vector<1x16xf32>
      %cst_37 = arith.constant dense<0.000000e+00> : vector<1xf32>
      %79 = vector.multi_reduction <add>, %78, %cst_37 [1] : vector<1x16xf32> to vector<1xf32>
      %80 = vector.shape_cast %79 : vector<1xf32> to vector<1x1xf32>
      %81 = vector.broadcast %80 : vector<1x1xf32> to vector<32x1xf32>
      %82 = arith.subf %77, %81 : vector<32x1xf32>
      %cst_38 = arith.constant 6.250000e-02 : f32
      %83 = vector.broadcast %cst_38 : f32 to vector<32x1xf32>
      %84 = arith.mulf %82, %83 : vector<32x1xf32>
      %c0_39 = arith.constant 0 : index
      %c0_40 = arith.constant 0 : index
      %c0_41 = arith.constant 0 : index
      %85 = vector.load %arg5[%c0_39, %c0_40, %c0_41] : memref<1x64x4xbf16, #tpu.memory_space<vmem>>, vector<1x64x4xbf16>
      %86 = vector.shape_cast %85 : vector<1x64x4xbf16> to vector<64x4xbf16>
      %87 = arith.extf %86 : vector<64x4xbf16> to vector<64x4xf32>
      %cst_42 = arith.constant dense<0.000000e+00> : vector<4xf32>
      %88 = vector.multi_reduction <add>, %87, %cst_42 [0] : vector<64x4xf32> to vector<4xf32>
      %89 = vector.shape_cast %88 : vector<4xf32> to vector<1x4xf32>
      %90 = arith.mulf %87, %87 : vector<64x4xf32>
      %cst_43 = arith.constant dense<0.000000e+00> : vector<4xf32>
      %91 = vector.multi_reduction <add>, %90, %cst_43 [0] : vector<64x4xf32> to vector<4xf32>
      %92 = vector.shape_cast %91 : vector<4xf32> to vector<1x4xf32>
      %cst_44 = arith.constant 1.562500e-02 : f32
      %93 = vector.broadcast %cst_44 : f32 to vector<1x4xf32>
      %94 = arith.mulf %89, %93 : vector<1x4xf32>
      %cst_45 = arith.constant 1.562500e-02 : f32
      %95 = vector.broadcast %cst_45 : f32 to vector<1x4xf32>
      %96 = arith.mulf %92, %95 : vector<1x4xf32>
      %97 = arith.mulf %94, %94 : vector<1x4xf32>
      %98 = arith.subf %96, %97 : vector<1x4xf32>
      %cst_46 = arith.constant 9.99999974E-6 : f32
      %99 = vector.broadcast %cst_46 : f32 to vector<1x4xf32>
      %100 = arith.addf %98, %99 : vector<1x4xf32>
      %101 = math.rsqrt %100 : vector<1x4xf32>
      %cst_47 = arith.constant dense<0.000000e+00> : vector<64x1xf32>
      %102 = tpu.matmul %87, %101, %cst_47 {dimension_numbers = #tpu.dot_dimension_numbers<[1], [1], [0], [0], [0, 0, 1, 0], [], []>} : vector<64x4xf32>, vector<1x4xf32>, vector<64x1xf32> -> vector<64x1xf32>
      %103 = arith.mulf %94, %101 : vector<1x4xf32>
      %cst_48 = arith.constant dense<0.000000e+00> : vector<1xf32>
      %104 = vector.multi_reduction <add>, %103, %cst_48 [1] : vector<1x4xf32> to vector<1xf32>
      %105 = vector.shape_cast %104 : vector<1xf32> to vector<1x1xf32>
      %106 = vector.broadcast %105 : vector<1x1xf32> to vector<64x1xf32>
      %107 = arith.subf %102, %106 : vector<64x1xf32>
      %cst_49 = arith.constant 2.500000e-01 : f32
      %108 = vector.broadcast %cst_49 : f32 to vector<64x1xf32>
      %109 = arith.mulf %107, %108 : vector<64x1xf32>
      %cst_50 = arith.constant 0.000000e+00 : f32
      %110 = vector.broadcast %cst_50 : f32 to vector<8x1xf32>
      %111 = tpu.concatenate %34, %59, %84, %109, %110 in 0 : vector<8x1xf32>, vector<16x1xf32>, vector<32x1xf32>, vector<64x1xf32>, vector<8x1xf32> -> vector<128x1xf32>
      %c0_51 = arith.constant 0 : index
      %c0_52 = arith.constant 0 : index
      %112 = vector.load %arg6[%c0_51, %c0_52] : memref<128x128xf32, #tpu.memory_space<vmem>>, vector<128x128xf32>
      %cst_53 = arith.constant dense<0.000000e+00> : vector<1x128xf32>
      %113 = tpu.matmul %111, %112, %cst_53 {dimension_numbers = #tpu.dot_dimension_numbers<[0], [0], [1], [1], [0, 1, 1, 1], [], []>} : vector<128x1xf32>, vector<128x128xf32>, vector<1x128xf32> -> vector<1x128xf32>
      %c0_54 = arith.constant 0 : index
      %c0_55 = arith.constant 0 : index
      %114 = vector.load %arg7[%c0_54, %c0_55] : memref<1x128xf32, #tpu.memory_space<vmem>>, vector<1x128xf32>
      %115 = arith.addf %113, %114 : vector<1x128xf32>
      %c0_56 = arith.constant 0 : index
      %c0_57 = arith.constant 0 : index
      %c0_58 = arith.constant 0 : index
      %116 = vector.load %arg8[%c0_56, %c0_57, %c0_58] : memref<1x1x128xf32, #tpu.memory_space<vmem>>, vector<1x1x128xf32>
      %117 = vector.shape_cast %116 : vector<1x1x128xf32> to vector<1x128xf32>
      %118 = vector.shape_cast %115 : vector<1x128xf32> to vector<1x1x128xf32>
      tpu.vector_store %arg8[%c0_56, %c0_57, %c0_58], %118 {strides = array<i32>} : memref<1x1x128xf32, #tpu.memory_space<vmem>>, vector<1x1x128xf32>,
    } else {
    }
    return
  }
  func.func @transform_0(%arg0: i32, %arg1: i32) -> (i32, i32, i32) {
    %c0_i32 = arith.constant 0 : i32
    %c0_i32_0 = arith.constant 0 : i32
    return %arg0, %c0_i32, %arg1 : i32, i32, i32
  }
  func.func @transform_1(%arg0: i32, %arg1: i32) -> (i32, i32, i32) {
    %c0_i32 = arith.constant 0 : i32
    %c0_i32_0 = arith.constant 0 : i32
    %c0_i32_1 = arith.constant 0 : i32
    return %arg0, %c0_i32, %c0_i32_0 : i32, i32, i32
  }
  func.func @transform_2(%arg0: i32, %arg1: i32) -> (i32, i32, i32) {
    %c0_i32 = arith.constant 0 : i32
    %c0_i32_0 = arith.constant 0 : i32
    %c0_i32_1 = arith.constant 0 : i32
    return %arg0, %c0_i32, %c0_i32_0 : i32, i32, i32
  }
  func.func @transform_3(%arg0: i32, %arg1: i32) -> (i32, i32, i32) {
    %c0_i32 = arith.constant 0 : i32
    %c0_i32_0 = arith.constant 0 : i32
    %c0_i32_1 = arith.constant 0 : i32
    return %arg0, %c0_i32, %c0_i32_0 : i32, i32, i32
  }
  func.func @transform_4(%arg0: i32, %arg1: i32) -> (i32, i32) {
    %c0_i32 = arith.constant 0 : i32
    %c0_i32_0 = arith.constant 0 : i32
    %c0_i32_1 = arith.constant 0 : i32
    return %c0_i32, %c0_i32_0 : i32, i32
  }
  func.func @transform_5(%arg0: i32, %arg1: i32) -> (i32, i32) {
    %c0_i32 = arith.constant 0 : i32
    %c0_i32_0 = arith.constant 0 : i32
    %c0_i32_1 = arith.constant 0 : i32
    return %c0_i32, %c0_i32_0 : i32, i32
  }
  func.func @transform_6(%arg0: i32, %arg1: i32) -> (i32, i32, i32) {
    %c0_i32 = arith.constant 0 : i32
    %c0_i32_0 = arith.constant 0 : i32
    %c0_i32_1 = arith.constant 0 : i32
    return %arg0, %c0_i32, %c0_i32_0 : i32, i32, i32
  }
}

</mosaic_0001>

<bundles_post_ra>
// kernel: tpu_custom_call.1
= control target key start
LH: loop header
LB: loop body
LE: loop exit
PB: predicated region body
PF: predicated region fallthrough
CT: control target
= control target key end

     0   :  { %s1571_s0 = inlined_call_operand.vmem [shape: bf16[2,8,256], index: 0, kind: input, shape index: {}]   ;;  %s1572_s1 = inlined_call_operand.vmem [shape: bf16[2,16,64], index: 1, kind: input, shape index: {}]   ;;  %s1573_s2 = inlined_call_operand.vmem [shape: bf16[2,32,16], index: 2, kind: input, shape index: {}]   ;;  %s1574_s3 = inlined_call_operand.vmem [shape: bf16[2,64,4], index: 3, kind: input, shape index: {}]   ;;  %s1575_s4 = inlined_call_operand.hbm [shape: f32[128,128], index: 4, kind: input, shape index: {}]   ;;  %s1576_s5 = inlined_call_operand.vmem [shape: f32[1,128], index: 5, kind: input, shape index: {}]   ;;  %s1577_s6 = inlined_call_operand.hbm [shape: f32[2,1,128], index: 6, kind: output, shape index: {}]  }
   0x1   :  { %1583 = sst [smem:[#allocation16_spill]] %s1575_s4 }
   0x2   :  { %11 = vsyncpa [#allocation4], 0 }
   0x3   :  { %12 = vsyncpa [#allocation5], 0 }
   0x4   :  { %14 = vsyncpa [#allocation5 + $0x1], 0  ;;  %s1257_s21 = smov 0   ;;  %s1259_s22 = smov 0  }
   0x5   :  { %s1261_s23 = smov 0   ;;  %s1263_s24 = smov 0  }
   0x6   :  { %s1265_s25 = smov 0   ;;  %s1267_s26 = smov 0  }
   0x7   :  { %s1269_s27 = smov 0   ;;  %s1271_s28 = smov 0  }
   0x8 LB: > { %1584 = sst [smem:[#allocation9_spill]] %s1193_s23  ;;  %s889_s29 = sadd.s32 4294967295, %s1213_s28   ;;  %s1213_s28 = sphi %s1271_s28, %s20_s28   ;;  %s1209_s27 = sphi %s1269_s27, %s1605_s27   ;;  %s1205_s26 = sphi %s1267_s26, %s1604_s26   ;;  %s1201_s25 = sphi %s1265_s25, %s1603_s25   ;;  %s1197_s24 = sphi %s1263_s24, %s1609_s24   ;;  %s1193_s23 = sphi %s1261_s23, %s1608_s23   ;;  %s1189_s22 = sphi %s1259_s22, %s1607_s22   ;;  %s1185_s21 = sphi %s1257_s21, %s1606_s21  }
   0x9   : > { %1585 = sst [smem:[#allocation10_spill]] %s1205_s26  ;;  %s890_s30 = sadd.s32 4294967294, %s1213_s28  }
   0xa   : > { %1586 = sst [smem:[#allocation11_spill]] %s1209_s27  ;;  %s29_s7 = sadd.s32 1, %s1205_s26 }
   0xb   : > { %s32_s8 = sadd.s32 1, %s1209_s27  ;;  %p30_p0 = scmp.ge.s32.totalorder %s29_s7, 2 }
   0xc   : > { %s187_s9 = sadd.s32 1, %s1193_s23  ;;  %p197_p1 = scmp.ne.s32.totalorder %s1193_s23, %s1189_s22 }
   0xd   : > { %p198_p2 = scmp.eq.s32.totalorder %s889_s29, 3  ;;  %s1611_s7 = smov (%p30_p0, %s29_s7), 0 }
   0xe   : > { %1587 = sst [smem:[#allocation12_spill]] %s1611_s7  ;;  %s1613_s8 = smov (!%p30_p0, %s32_s8), %s1209_s27 }
   0xf   : > { %p1307_p3 = por %p198_p2, %p197_p1  ;;  %p203_p4 = scmp.ne.s32.totalorder %s1189_s22, %s1185_s21 }
  0x10   : > { %p34_p5 = scmp.ge.s32.totalorder %s1613_s8, 2  ;;  %p204_p6 = scmp.eq.s32.totalorder %s890_s30, 3 }
  0x11   : > { %p891_p7 = scmp.ge.s32.totalorder %s1213_s28, 1  ;;  %p211_p8 = scmp.lt.s32.totalorder %s1213_s28, 5 }
  0x12   : > { %s1615_s8 = smov (%p34_p5, %s1613_s8), 0  ;;  %p1317_p9 = por %p204_p6, %p203_p4 }
  0x13   : > { %1589 = sst [smem:[#allocation13_spill]] %s1615_s8  ;;  %p1321_p10 = pnand %p891_p7, %p211_p8 }
  0x14   : > { %s1590_s11 = scalar_select %p1317_p9, 1, 0 }
  0x15   : > { %s184_s13 = ssub.s32 %s1209_s27, %s1615_s8  ;;  %p1002_p12 = pneg %p1321_p10 }
  0x16   : > { %1591 = sst [smem:[#allocation14_spill]] %s1590_s11  ;;  %p185_p11 = scmp.eq.s32.totalorder %s184_s13, 0 }
  0x17   : > { %p1329_p13 = scmp.eq.s32.totalorder %s889_s29, 0  ;;  %s1215_s16 = smov [#allocation3]  }
  0x18   : > { %s1334_s15 = scalar_select %p185_p11, %s1193_s23, %s187_s9  }
  0x19   : > { %s223_s17 = sshll.u32 %s1215_s16, 4  ;;  %p1338_p0 = pnand %p1329_p13, %p1002_p12  ;;  %s224_s17 = int_to_ptr.vmem [resolvable:$true] %s223_s17 }
  0x1a   : > { %1594 = sst [smem:[#allocation15_spill]] %s1334_s15  ;;  %s1102_s19 = scalar_lea.vmem %s224_s17, 2048 }
  0x1b   : > { %p1093_p1 = pneg %p1338_p0  ;;  %p1103_p2 = scmp.ne.s32.totalorder %s224_s17, %s1102_s19 }
  0x1c   : > { %p1110_p6 = scmp.lt.s32.totalorder %s224_s17, %s224_s17  ;;  %p1111_p7 = scmp.lt.s32.totalorder %s1102_s19, %s1102_s19 }
  0x1d   : > { %p1105_p4 = pnand %p1103_p2, %p1093_p1 }
  0x1e   : > { %p1112_p8 = por %p1111_p7, %p1110_p6 }
  0x1f   : > { %p1106_p5 = pneg %p1105_p4 }
  0x21   : > { %p1113_p11 = pnand %p1112_p8, %p1106_p5 }
  0x23   : > { %1116 = shalt.err (!%p1113_p11)
}
  0x24   : > { %s1216_s20 = smov 128   ;;  %s1217_s29 = smov 8  }
  0x25   : > { %s1596_s4 = sld [smem:[#allocation16_spill]] }
  0x27   : > { %277 = sbr.rel (%p1321_p10) target bundleno = 780 (0x30c), region = 44 }
  0x2b   : > { %1005 = dma.hbm_to_vmem [thread:$0]  (!%p1338_p0), %s1596_s4, 2048, %s224_s17, [#allocation4], %s1216_s20, %s1216_s20, %s1217_s29  }
  0x2c   : > { %1176 = dma.done.wait (%p1329_p13), [#allocation4], 2048  }
  0x2d   : > { %1178 = vsyncadd (%p1329_p13), [#allocation4], 4294965248  ;;  %p324_p12 = scmp.lt.s32.totalorder %s1201_s25, 1  ;;  %p326_p1 = scmp.lt.s32.totalorder %s1197_s24, 1 }
  0x2e   : > { %p904_p10 = scmp.ne.s32.totalorder %s1197_s24, 0 }
  0x2f   : > { %s325_s16 = scalar_select %p324_p12, %s1201_s25, 1 }
  0x30   : > { %s327_s17 = scalar_select %p326_p1, %s1197_s24, 1 }
  0x31   : > { %s896_s18 = sshll.u32 %s325_s16, 1  ;;  %s909_s12 = sshll.u32 %s325_s16, 3 }
  0x32   : > { %s329_s19 = sadd.s32 %s896_s18, %s327_s17  ;;  %s1363_s30 = scalar_lea.vmem %s1572_s1, %s909_s12 }
  0x33   : > { %s897_s14 = sshll.u32 %s329_s19, 2  ;;  %s910_s9 = sshll.u32 %s325_s16, 4 }
  0x34   : > { %s331_s7 = scalar_lea.vmem %s1571_s0, %s897_s14  ;;  %s1371_s26 = scalar_lea.vmem %s1573_s2, %s910_s9 }
  0x35   : > { %s911_s15 = sshll.u32 %s325_s16, 5  ;;  %s1597_s18 = sand.u32 1, %s1189_s22  }
  0x36   : > { %s1376_s17 = scalar_lea.vmem %s1574_s3, %s911_s15  ;;  %s1380_s12 = scalar_lea.vmem [#allocation6], %s1597_s18 }
  0x37   : > { %350 = sbr.rel (%p904_p10) target bundleno = 62 (0x3e), region = 52 }
  0x3c   : > { %vm351_vm0 = vcmask 7168   ;;  %v1218_v0 = vmov 0.0  }
  0x3d   : > { %352 = vst.msk [vmem:[#allocation2] sm:$0xff] %vm351_vm0, %v1218_v0 }
  0x3e PF: > { %v354_v1 = vld [vmem:[%s331_s7] sm:$0xf]  ;;  %vm383_vm1 = vcmask 7168   ;;  %p905_p13 = scmp.ne.s32.totalorder %s1197_s24, 1 }
  0x3f   : > { %v355_v2 = vunpack.c.l.bf16 %v354_v1 }
  0x41   : > { %v356_v3 = vrot.slane %v355_v2, 4  ;;  %v362_v4 = vmul.f32 %v355_v2, %v355_v2 }
  0x43   : > { %v357_v5 = vadd.f32 %v356_v3, %v355_v2  ;;  %v363_v6 = vrot.slane %v362_v4, 4 }
  0x44   : > { %v353_v26 = vld [vmem:[#allocation2] sm:$0xff] }
  0x45   : > { %v358_v7 = vrot.slane %v357_v5, 2  ;;  %v364_v8 = vadd.f32 %v363_v6, %v362_v4 }
  0x47   : > { %v359_v9 = vadd.f32 %v358_v7, %v357_v5  ;;  %v365_v10 = vrot.slane %v364_v8, 2 }
  0x49   : > { %v360_v11 = vrot.slane %v359_v9, 1  ;;  %v366_v12 = vadd.f32 %v365_v10, %v364_v8 }
  0x4b   : > { %v361_v13 = vadd.f32 %v360_v11, %v359_v9  ;;  %v367_v14 = vrot.slane %v366_v12, 1 }
  0x4d   : > { %v368_v15 = vadd.f32 %v367_v14, %v366_v12  ;;  %v369_v16 = vmul.f32 0.125, %v361_v13 }
  0x4f   : > { %v370_v17 = vmul.f32 0.125, %v368_v15  ;;  %v371_v18 = vmul.f32 %v369_v16, %v369_v16 }
  0x51   : > { %v372_v19 = vsub.f32 %v370_v17, %v371_v18 }
  0x53   : > { %v373_v20 = vadd.f32 1e-05, %v372_v19 }
  0x55   : > { %1083 = vrsqrt.f32 %v373_v20 }
  0x62   : > { %v1084_v21 = vpop.eup %1083 }
  0x63   : > { %v375_v22 = vmul.f32 %v1084_v21, %v355_v2  ;;  %v378_v23 = vmul.f32 %v1084_v21, %v369_v16 }
  0x65   : > { %376 = vadd.xlane.f32.xlu0 %v375_v22 }
  0x69   : > { %379 = vadd.xlane.f32.xlu0 %v378_v23 }
  0xee   : > { %v377_v24 = vpop.xlane.xlu0 %376 }
  0xf2   : > { %v380_v25 = vpop.xlane.xlu0 %379 }
  0xf3   : > { %v381_v27 = vsub.f32 %v377_v24, %v380_v25  ;;  %388 = sbr.rel (%p905_p13) target bundleno = 756 (0x2f4), region = 56 }
  0xf5   : > { %v382_v28 = vadd.f32 %v381_v27, %v353_v26 }
  0xf7   : > { %384 = vst.msk [vmem:[#allocation2] sm:$0xff] %vm383_vm1, %v382_v28 }
  0xf8   : > { %v913_v29 = vld [vmem:[%s1363_s30] sm:$0xff]   ;;  %vm395_vm2 = vcmask 523264   ;;  %v940_v31 = vld [vmem:[%s1371_s26 + $0x8] sm:$0xff]   ;;  %vm446_vm3 = vcmask 130048   ;;  %vm527_vm4 = vcmask 31744   ;;  %v942_v1 = vld [vmem:[%s1376_s17 + $0x10] sm:$0xff]  }
  0xf9   : > { %v917_v30 = vld [vmem:[%s1371_s26] sm:$0xff]   ;;  %v1387_v32 = vunpack.c.l.bf16 %v913_v29  ;;  %v1389_v33 = vunpack.c.h.bf16 %v913_v29  ;;  %v1396_v37 = vunpack.c.l.bf16 %v940_v31  ;;  %v1398_v38 = vunpack.c.h.bf16 %v940_v31  ;;  %v941_v56 = vld [vmem:[%s1376_s17 + $0x8] sm:$0xff]   ;;  %v943_v16 = vld [vmem:[%s1376_s17 + $0x18] sm:$0xff]  }
  0xfa   : > { %v1391_v34 = vunpack.c.l.bf16 %v917_v30  ;;  %v1393_v35 = vunpack.c.h.bf16 %v917_v30  ;;  %v925_v36 = vld [vmem:[%s1376_s17] sm:$0xff]   ;;  %v1435_v5 = vunpack.c.l.bf16 %v941_v56  ;;  %v1438_v11 = vunpack.c.h.bf16 %v941_v56 }
  0xfb   : > { %v1400_v39 = vunpack.c.l.bf16 %v925_v36  ;;  %v396_v40 = vsel %vm395_vm2, %v1387_v32, 0.0  ;;  %v397_v41 = vsel %vm395_vm2, %v1389_v33, 0.0  ;;  %v405_v42 = vmul.f32 %v1387_v32, %v1387_v32 }
  0xfc   : > { %v406_v43 = vmul.f32 %v1389_v33, %v1389_v33  ;;  %v398_v44 = vadd.f32 %v397_v41, %v396_v40  ;;  %v447_v45 = vsel %vm446_vm3, %v1391_v34, 0.0  ;;  %v448_v46 = vsel %vm446_vm3, %v1393_v35, 0.0 }
  0xfd   : > { %v450_v47 = vsel %vm446_vm3, %v1396_v37, 0.0  ;;  %v407_v48 = vsel %vm395_vm2, %v405_v42, 0.0  ;;  %v449_v50 = vadd.f32 %v448_v46, %v447_v45  ;;  %v452_v51 = vsel %vm446_vm3, %v1398_v38, 0.0 }
  0xfe   : > { %v408_v49 = vsel %vm395_vm2, %v406_v43, 0.0  ;;  %v399_v52 = vrot.slane %v398_v44, 4  ;;  %v460_v54 = vmul.f32 %v1391_v34, %v1391_v34  ;;  %v461_v55 = vmul.f32 %v1393_v35, %v1393_v35 }
  0xff   : > { %v409_v53 = vadd.f32 %v408_v49, %v407_v48  ;;  %v451_v57 = vadd.f32 %v450_v47, %v449_v50  ;;  %v462_v58 = vmul.f32 %v1396_v37, %v1396_v37  ;;  %v463_v59 = vmul.f32 %v1398_v38, %v1398_v38 }
 0x100   : > { %v1429_v60 = vunpack.c.h.bf16 %v925_v36  ;;  %v400_v61 = vadd.f32 %v399_v52, %v398_v44  ;;  %v464_v63 = vsel %vm446_vm3, %v460_v54, 0.0  ;;  %v465_v0 = vsel %vm446_vm3, %v461_v55, 0.0 }
 0x101   : > { %v410_v62 = vrot.slane %v409_v53, 4  ;;  %v453_v2 = vadd.f32 %v452_v51, %v451_v57  ;;  %v466_v3 = vadd.f32 %v465_v0, %v464_v63  ;;  %v467_v4 = vsel %vm446_vm3, %v462_v58, 0.0 }
 0x102   : > { %v401_v6 = vrot.slane %v400_v61, 2  ;;  %v469_v8 = vsel %vm446_vm3, %v463_v59, 0.0  ;;  %v1440_v12 = vunpack.c.l.bf16 %v942_v1  ;;  %v1442_v15 = vunpack.c.h.bf16 %v942_v1 }
 0x103   : > { %v411_v7 = vadd.f32 %v410_v62, %v409_v53  ;;  %v454_v9 = vrot.slane %v453_v2, 4  ;;  %v468_v10 = vadd.f32 %v467_v4, %v466_v3  ;;  %v528_v17 = vsel %vm527_vm4, %v1400_v39, 0.0 }
 0x104   : > { %v402_v13 = vadd.f32 %v401_v6, %v400_v61  ;;  %v529_v20 = vsel %vm527_vm4, %v1429_v60, 0.0  ;;  %v531_v21 = vsel %vm527_vm4, %v1435_v5, 0.0  ;;  %v1451_v27 = vunpack.c.l.bf16 %v943_v16 }
 0x105   : > { %v412_v14 = vrot.slane %v411_v7, 2  ;;  %v455_v18 = vadd.f32 %v454_v9, %v453_v2  ;;  %v470_v19 = vadd.f32 %v469_v8, %v468_v10  ;;  %v530_v24 = vadd.f32 %v529_v20, %v528_v17 }
 0x106   : > { %v403_v22 = vrot.slane %v402_v13, 1  ;;  %v533_v28 = vsel %vm527_vm4, %v1438_v11, 0.0  ;;  %v1455_v31 = vunpack.c.h.bf16 %v943_v16  ;;  %v535_v42 = vsel %vm527_vm4, %v1440_v12, 0.0 }
 0x107   : > { %v413_v23 = vadd.f32 %v412_v14, %v411_v7  ;;  %v456_v25 = vrot.slane %v455_v18, 2  ;;  %v471_v26 = vrot.slane %v470_v19, 4  ;;  %v532_v36 = vadd.f32 %v531_v21, %v530_v24 }
 0x108   : > { %v404_v29 = vadd.f32 %v403_v22, %v402_v13  ;;  %v537_v43 = vsel %vm527_vm4, %v1442_v15, 0.0  ;;  %v549_v47 = vmul.f32 %v1400_v39, %v1400_v39  ;;  %v550_v50 = vmul.f32 %v1429_v60, %v1429_v60 }
 0x109   : > { %v414_v30 = vrot.slane %v413_v23, 1  ;;  %v457_v40 = vadd.f32 %v456_v25, %v455_v18  ;;  %v472_v41 = vadd.f32 %v471_v26, %v470_v19  ;;  %v534_v46 = vadd.f32 %v533_v28, %v532_v36 }
 0x10a   : > { %v416_v45 = vmul.f32 0.0625, %v404_v29  ;;  %v551_v51 = vmul.f32 %v1435_v5, %v1435_v5  ;;  %v539_v55 = vsel %vm527_vm4, %v1451_v27, 0.0  ;;  %v541_v58 = vsel %vm527_vm4, %v1455_v31, 0.0 }
 0x10b   : > { %v415_v44 = vadd.f32 %v414_v30, %v413_v23  ;;  %v458_v48 = vrot.slane %v457_v40, 1  ;;  %v473_v49 = vrot.slane %v472_v41, 2  ;;  %v536_v54 = vadd.f32 %v535_v42, %v534_v46 }
 0x10c   : > { %v418_v53 = vmul.f32 %v416_v45, %v416_v45  ;;  %v552_v59 = vmul.f32 %v1438_v11, %v1438_v11  ;;  %v553_v63 = vmul.f32 %v1440_v12, %v1440_v12  ;;  %v557_v0 = vsel %vm527_vm4, %v549_v47, 0.0 }
 0x10d   : > { %v417_v52 = vmul.f32 0.0625, %v415_v44  ;;  %v459_v56 = vadd.f32 %v458_v48, %v457_v40  ;;  %v474_v57 = vadd.f32 %v473_v49, %v472_v41  ;;  %v538_v62 = vadd.f32 %v537_v43, %v536_v54 }
 0x10e   : > { %v558_v3 = vsel %vm527_vm4, %v550_v50, 0.0  ;;  %v560_v4 = vsel %vm527_vm4, %v551_v51, 0.0  ;;  %v554_v13 = vmul.f32 %v1442_v15, %v1442_v15  ;;  %v562_v14 = vsel %vm527_vm4, %v552_v59, 0.0 }
 0x10f   : > { %v419_v61 = vsub.f32 %v417_v52, %v418_v53  ;;  %v475_v1 = vrot.slane %v474_v57, 1  ;;  %v477_v2 = vmul.f32 0.03125, %v459_v56  ;;  %v540_v7 = vadd.f32 %v539_v55, %v538_v62 }
 0x110   : > { %v559_v8 = vadd.f32 %v558_v3, %v557_v0  ;;  %v555_v19 = vmul.f32 %v1451_v27, %v1451_v27  ;;  %v564_v20 = vsel %vm527_vm4, %v553_v63, 0.0  ;;  %v556_v24 = vmul.f32 %v1455_v31, %v1455_v31 }
 0x111   : > { %v420_v6 = vadd.f32 1e-05, %v419_v61  ;;  %v476_v9 = vadd.f32 %v475_v1, %v474_v57  ;;  %v479_v10 = vmul.f32 %v477_v2, %v477_v2  ;;  %v542_v16 = vadd.f32 %v541_v58, %v540_v7 }
 0x112   : > { %v561_v17 = vadd.f32 %v560_v4, %v559_v8  ;;  %v566_v25 = vsel %vm527_vm4, %v554_v13, 0.0  ;;  %v568_v30 = vsel %vm527_vm4, %v555_v19, 0.0  ;;  %v570_v41 = vsel %vm527_vm4, %v556_v24, 0.0 }
 0x113   : > { %1085 = vrsqrt.f32 %v420_v6  ;;  %v478_v18 = vmul.f32 0.03125, %v476_v9  ;;  %v543_v21 = vrot.slane %v542_v16, 4  ;;  %vm1220_vm5 = vmmov 0  }
 0x114   : > { %v563_v22 = vadd.f32 %v562_v14, %v561_v17 }
 0x115   : > { %v480_v23 = vsub.f32 %v478_v18, %v479_v10  ;;  %v544_v26 = vadd.f32 %v543_v21, %v542_v16 }
 0x116   : > { %v565_v28 = vadd.f32 %v564_v20, %v563_v22 }
 0x117   : > { %v481_v29 = vadd.f32 1e-05, %v480_v23  ;;  %v545_v36 = vrot.slane %v544_v26, 2 }
 0x118   : > { %v567_v40 = vadd.f32 %v566_v25, %v565_v28  ;;  %v651_v25 = vld [vmem:[#allocation3 + $0x78] sm:$0xff]  ;;  %v650_v28 = vld [vmem:[#allocation3 + $0x70] sm:$0xff] }
 0x119   : > { %1087 = vrsqrt.f32 %v481_v29  ;;  %v546_v42 = vadd.f32 %v545_v36, %v544_v26  ;;  %v1219_v26 = vmov 0.0   ;;  %v646_v29 = vld [vmem:[#allocation3 + $0x50] sm:$0xff]  ;;  %v644_v36 = vld [vmem:[#allocation3 + $0x40] sm:$0xff] }
 0x11a   : > { %v569_v43 = vadd.f32 %v568_v30, %v567_v40  ;;  %961 = vmatprep.subr.mxu0 %v1219_v26  ;;  %993 = vmatprep.mubr.msk.f32.mxu0 %vm1220_vm5, %v1219_v26  ;;  %v645_v30 = vld [vmem:[#allocation3 + $0x48] sm:$0xff]  ;;  %v389_v40 = vld [vmem:[#allocation2] sm:$0xff] }
 0x11b   : > { %v547_v44 = vrot.slane %v546_v42, 1  ;;  %962 = vmatpush3.msra.mxu0 %v651_v25 }
 0x11c   : > { %v571_v46 = vadd.f32 %v570_v41, %v569_v43  ;;  %963 = vmatprep.subr.mxu0 %v1219_v26  ;;  %v643_v41 = vld [vmem:[#allocation3 + $0x38] sm:$0xff]  ;;  %v642_v43 = vld [vmem:[#allocation3 + $0x30] sm:$0xff] }
 0x11d   : > { %v548_v49 = vadd.f32 %v547_v44, %v546_v42  ;;  %964 = vmatpush3.msra.mxu0 %v650_v28  ;;  %v390_v42 = vmul.f32 0.00390625, %v389_v40  ;;  %v641_v44 = vld [vmem:[#allocation3 + $0x28] sm:$0xff] }
 0x11e   : > { %v572_v47 = vrot.slane %v571_v46, 4  ;;  %965 = vmatprep.subr.mxu0 %v1219_v26 }
 0x11f   : > { %v578_v59 = vmul.f32 0.015625, %v548_v49  ;;  %v637_v49 = vld [vmem:[#allocation3 + $0x8] sm:$0xff] }
 0x120   : > { %v1086_v48 = vpop.eup %1085  ;;  %v573_v53 = vadd.f32 %v572_v47, %v571_v46  ;;  %v640_v46 = vld [vmem:[#allocation3 + $0x20] sm:$0xff]  ;;  %v639_v47 = vld [vmem:[#allocation3 + $0x18] sm:$0xff] }
 0x121   : > { %v423_v50 = vmul.f32 %v1086_v48, %v1389_v33  ;;  %v422_v51 = vmul.f32 %v1086_v48, %v1387_v32  ;;  %v430_v52 = vmul.f32 %v1086_v48, %v416_v45  ;;  %v580_v1 = vmul.f32 %v578_v59, %v578_v59  ;;  %v638_v48 = vld [vmem:[#allocation3 + $0x10] sm:$0xff] }
 0x122   : > { %v574_v56 = vrot.slane %v573_v53, 2 }
 0x123   : > { %v427_v54 = vsel %vm395_vm2, %v423_v50, 0.0  ;;  %v424_v55 = vsel %vm395_vm2, %v422_v51, 0.0  ;;  %v431_v57 = vsel %vm395_vm2, %v430_v52, 0.0  ;;  %v636_v50 = vld [vmem:[#allocation3] sm:$0xff] }
 0x124   : > { %428 = vadd.xlane.f32.xlu1 %v427_v54  ;;  %425 = vadd.xlane.f32.xlu0 %v424_v55  ;;  %v575_v58 = vadd.f32 %v574_v56, %v573_v53 }
 0x126   : > { %v1088_v61 = vpop.eup %1087  ;;  %v576_v62 = vrot.slane %v575_v58, 1 }
 0x127   : > { %v483_v63 = vmul.f32 %v1088_v61, %v1391_v34  ;;  %v484_v32 = vmul.f32 %v1088_v61, %v1393_v35  ;;  %v499_v33 = vmul.f32 %v1088_v61, %v477_v2  ;;  %v485_v45 = vmul.f32 %v1088_v61, %v1396_v37 }
 0x128   : > { %432 = vadd.xlane.f32.xlu0 %v431_v57  ;;  %v577_v0 = vadd.f32 %v576_v62, %v575_v58  ;;  %v486_v8 = vmul.f32 %v1088_v61, %v1398_v38 }
 0x129   : > { %v487_v3 = vsel %vm446_vm3, %v483_v63, 0.0  ;;  %v500_v4 = vsel %vm446_vm3, %v499_v33, 0.0  ;;  %v490_v7 = vsel %vm446_vm3, %v484_v32, 0.0  ;;  %v493_v34 = vsel %vm446_vm3, %v485_v45, 0.0 }
 0x12a   : > { %488 = vadd.xlane.f32.xlu1 %v487_v3  ;;  %v579_v6 = vmul.f32 0.015625, %v577_v0  ;;  %v496_v37 = vsel %vm446_vm3, %v486_v8, 0.0 }
 0x12c   : > { %501 = vadd.xlane.f32.xlu0 %v500_v4  ;;  %v581_v9 = vsub.f32 %v579_v6, %v580_v1 }
 0x12e   : > { %491 = vadd.xlane.f32.xlu1 %v490_v7  ;;  %v582_v35 = vadd.f32 1e-05, %v581_v9 }
 0x130   : > { %494 = vadd.xlane.f32.xlu0 %v493_v34  ;;  %1089 = vrsqrt.f32 %v582_v35 }
 0x132   : > { %497 = vadd.xlane.f32.xlu1 %v496_v37 }
 0x13d   : > { %v1090_v2 = vpop.eup %1089 }
 0x13e   : > { %v616_v10 = vmul.f32 %v1090_v2, %v578_v59  ;;  %v584_v13 = vmul.f32 %v1090_v2, %v1400_v39  ;;  %v586_v14 = vmul.f32 %v1090_v2, %v1435_v5  ;;  %v585_v16 = vmul.f32 %v1090_v2, %v1429_v60 }
 0x13f   : > { %v588_v20 = vmul.f32 %v1090_v2, %v1440_v12  ;;  %v587_v21 = vmul.f32 %v1090_v2, %v1438_v11  ;;  %v590_v5 = vmul.f32 %v1090_v2, %v1451_v27  ;;  %v589_v22 = vmul.f32 %v1090_v2, %v1442_v15  ;;  %v649_v15 = vld [vmem:[#allocation3 + $0x68] sm:$0xff]  ;;  %v648_v27 = vld [vmem:[#allocation3 + $0x60] sm:$0xff] }
 0x140   : > { %v617_v38 = vsel %vm527_vm4, %v616_v10, 0.0  ;;  %v592_v17 = vsel %vm527_vm4, %v584_v13, 0.0  ;;  %v598_v18 = vsel %vm527_vm4, %v586_v14, 0.0  ;;  %v595_v19 = vsel %vm527_vm4, %v585_v16, 0.0  ;;  %966 = vmatpush3.msra.mxu0 %v649_v15 }
 0x141   : > { %618 = vadd.xlane.f32.xlu1 %v617_v38  ;;  %593 = vadd.xlane.f32.xlu0 %v592_v17  ;;  %v604_v39 = vsel %vm527_vm4, %v588_v20, 0.0  ;;  %v601_v60 = vsel %vm527_vm4, %v587_v21, 0.0  ;;  %v610_v23 = vsel %vm527_vm4, %v590_v5, 0.0  ;;  %v607_v24 = vsel %vm527_vm4, %v589_v22, 0.0 }
 0x142   : > { %v591_v12 = vmul.f32 %v1090_v2, %v1455_v31  ;;  %967 = vmatprep.subr.mxu0 %v1219_v26  ;;  %v647_v31 = vld [vmem:[#allocation3 + $0x58] sm:$0xff] }
 0x143   : > { %968 = vmatpush3.msra.mxu0 %v648_v27 }
 0x144   : > { %v613_v11 = vsel %vm527_vm4, %v591_v12, 0.0  ;;  %969 = vmatprep.subr.mxu0 %v1219_v26 }
 0x145   : > { %599 = vadd.xlane.f32.xlu1 %v598_v18  ;;  %596 = vadd.xlane.f32.xlu0 %v595_v19 }
 0x146   : > { %970 = vmatpush3.msra.mxu0 %v647_v31 }
 0x147   : > { %971 = vmatprep.subr.mxu0 %v1219_v26 }
 0x148   : > { %972 = vmatpush3.msra.mxu0 %v646_v29 }
 0x149   : > { %605 = vadd.xlane.f32.xlu1 %v604_v39  ;;  %602 = vadd.xlane.f32.xlu0 %v601_v60 }
 0x14a   : > { %973 = vmatprep.subr.mxu0 %v1219_v26 }
 0x14b   : > { %974 = vmatpush3.msra.mxu0 %v645_v30 }
 0x14c   : > { %975 = vmatprep.subr.mxu0 %v1219_v26 }
 0x14d   : > { %611 = vadd.xlane.f32.xlu1 %v610_v23  ;;  %608 = vadd.xlane.f32.xlu0 %v607_v24 }
 0x14e   : > { %976 = vmatpush3.msra.mxu0 %v644_v36 }
 0x14f   : > { %977 = vmatprep.subr.mxu0 %v1219_v26 }
 0x150   : > { %978 = vmatpush3.msra.mxu0 %v643_v41 }
 0x151   : > { %614 = vadd.xlane.f32.xlu0 %v613_v11  ;;  %979 = vmatprep.subr.mxu0 %v1219_v26 }
 0x152   : > { %980 = vmatpush3.msra.mxu0 %v642_v43 }
 0x153   : > { %981 = vmatprep.subr.mxu0 %v1219_v26 }
 0x154   : > { %982 = vmatpush3.msra.mxu0 %v641_v44 }
 0x155   : > { %983 = vmatprep.subr.mxu0 %v1219_v26 }
 0x156   : > { %984 = vmatpush3.msra.mxu0 %v640_v46 }
 0x157   : > { %985 = vmatprep.subr.mxu0 %v1219_v26 }
 0x158   : > { %986 = vmatpush3.msra.mxu0 %v639_v47 }
 0x159   : > { %987 = vmatprep.subr.mxu0 %v1219_v26 }
 0x15a   : > { %988 = vmatpush3.msra.mxu0 %v638_v48 }
 0x15b   : > { %989 = vmatprep.subr.mxu0 %v1219_v26 }
 0x15c   : > { %990 = vmatpush3.msra.mxu0 %v637_v49 }
 0x15d   : > { %991 = vmatprep.subr.mxu0 %v1219_v26  ;;  %v652_v26 = vld [vmem:[%s1576_s5] sm:$0x1] }
 0x15e   : > { %992 = vmatpush3.msra.mxu0 %v636_v50 }
 0x180   : > { %653 = vxpose.xlu1.b32.start [1/15] (short) (narrow) %v390_v42, 8 }
 0x1ad   : > { %v426_v51 = vpop.xlane.xlu0 %425  ;;  %v429_v52 = vpop.xlane.xlu1 %428 }
 0x1b1   : > { %v433_v53 = vpop.xlane.xlu0 %432 }
 0x1b2   : > { %v434_v54 = vsub.f32 %v426_v51, %v433_v53  ;;  %v435_v55 = vsub.f32 %v429_v52, %v433_v53 }
 0x1b3   : > { %v489_v57 = vpop.xlane.xlu1 %488 }
 0x1b4   : > { %v436_v56 = vmul.f32 0.015625, %v434_v54  ;;  %v437_v61 = vmul.f32 0.015625, %v435_v55 }
 0x1b5   : > { %v502_v58 = vpop.xlane.xlu0 %501 }
 0x1b6   : > { %654 = vxpose.xlu1.b32.cont [2/15] (short) (narrow) %v436_v56, 8  ;;  %v503_v59 = vsub.f32 %v489_v57, %v502_v58 }
 0x1b7   : > { %v492_v63 = vpop.xlane.xlu1 %491 }
 0x1b8   : > { %v507_v62 = vmul.f32 0.0625, %v503_v59  ;;  %v504_v32 = vsub.f32 %v492_v63, %v502_v58 }
 0x1b9   : > { %v495_v33 = vpop.xlane.xlu0 %494 }
 0x1ba   : > { %655 = vxpose.xlu1.b32.cont [3/15] (short) (narrow) %v437_v61, 8  ;;  %v505_v45 = vsub.f32 %v495_v33, %v502_v58  ;;  %v508_v0 = vmul.f32 0.0625, %v504_v32 }
 0x1bb   : > { %v498_v1 = vpop.xlane.xlu1 %497 }
 0x1bc   : > { %v506_v3 = vsub.f32 %v498_v1, %v502_v58  ;;  %v509_v4 = vmul.f32 0.0625, %v505_v45 }
 0x1be   : > { %656 = vxpose.xlu1.b32.cont [4/15] (short) (narrow) %v507_v62, 8  ;;  %v510_v6 = vmul.f32 0.0625, %v506_v3 }
 0x1c2   : > { %657 = vxpose.xlu1.b32.cont [5/15] (short) (narrow) %v508_v0, 8 }
 0x1c6   : > { %658 = vxpose.xlu1.b32.cont [6/15] (short) (narrow) %v509_v4, 8 }
 0x1ca   : > { %659 = vxpose.xlu1.b32.cont [7/15] (short) (narrow) %v510_v6, 8  ;;  %v619_v7 = vpop.xlane.xlu1 %618  ;;  %v594_v8 = vpop.xlane.xlu0 %593 }
 0x1cb   : > { %v620_v34 = vsub.f32 %v594_v8, %v619_v7 }
 0x1cd   : > { %v628_v9 = vmul.f32 0.25, %v620_v34 }
 0x1ce   : > { %v597_v35 = vpop.xlane.xlu0 %596  ;;  %v600_v2 = vpop.xlane.xlu1 %599 }
 0x1cf   : > { %v621_v37 = vsub.f32 %v597_v35, %v619_v7  ;;  %660 = vxpose.xlu1.b32.cont [8/15] (short) (narrow) %v628_v9, 8  ;;  %v622_v10 = vsub.f32 %v600_v2, %v619_v7 }
 0x1d1   : > { %v629_v13 = vmul.f32 0.25, %v621_v37  ;;  %v630_v16 = vmul.f32 0.25, %v622_v10 }
 0x1d2   : > { %v603_v14 = vpop.xlane.xlu0 %602  ;;  %v606_v17 = vpop.xlane.xlu1 %605 }
 0x1d3   : > { %661 = vxpose.xlu1.b32.cont [9/15] (short) (narrow) %v629_v13, 8  ;;  %v623_v38 = vsub.f32 %v603_v14, %v619_v7  ;;  %v624_v18 = vsub.f32 %v606_v17, %v619_v7 }
 0x1d5   : > { %v631_v19 = vmul.f32 0.25, %v623_v38  ;;  %v632_v21 = vmul.f32 0.25, %v624_v18 }
 0x1d6   : > { %v609_v20 = vpop.xlane.xlu0 %608  ;;  %v612_v60 = vpop.xlane.xlu1 %611 }
 0x1d7   : > { %662 = vxpose.xlu1.b32.cont [10/15] (short) (narrow) %v630_v16, 8  ;;  %v625_v39 = vsub.f32 %v609_v20, %v619_v7  ;;  %v626_v5 = vsub.f32 %v612_v60, %v619_v7 }
 0x1d9   : > { %v633_v22 = vmul.f32 0.25, %v625_v39  ;;  %v634_v24 = vmul.f32 0.25, %v626_v5 }
 0x1da   : > { %v615_v23 = vpop.xlane.xlu0 %614 }
 0x1db   : > { %663 = vxpose.xlu1.b32.cont [11/15] (short) (narrow) %v631_v19, 8  ;;  %v627_v12 = vsub.f32 %v615_v23, %v619_v7 }
 0x1dd   : > { %v635_v11 = vmul.f32 0.25, %v627_v12 }
 0x1df   : > { %664 = vxpose.xlu1.b32.cont [12/15] (short) (narrow) %v632_v21, 8 }
 0x1e3   : > { %665 = vxpose.xlu1.b32.cont [13/15] (short) (narrow) %v633_v22, 8 }
 0x1e7   : > { %666 = vxpose.xlu1.b32.cont [14/15] (short) (narrow) %v634_v24, 8 }
 0x1eb   : > { %667 = vxpose.xlu1.b32.end [15/15] (short) (narrow) %v635_v11, 8 }
 0x22f   : > { %v669_v25 = vpop.trf.xlu1 }
 0x230   : > { %994 = vmatmul.mubr.f32.vlgmr.msra.gmra.mxu0 %v669_v25 }
 0x2f0   : > { %v751_v28 = vpop.f32.mrf.mxu0 }
 0x2f1   : > { %v752_v15 = vadd.f32 %v751_v28, %v652_v26 }
 0x2f2   : > { %v995_v27 = vpop.f32.mrf.mxu0 }
 0x2f3   : > { %755 = vst [vmem:[%s1380_s12] sm:$0x1] %v752_v15 }
 0x2f4 PF: > { %s906_s24 = sshll.u32 %s1201_s25, 4  ;;  %s769_s8 = sshll.u32 %s1380_s12, 4  ;;  %s770_s8 = int_to_ptr.vmem [resolvable:$true] %s769_s8 }
 0x2f5   : > { %s767_s7 = scalar_lea.hbm %s1577_s6, %s906_s24  ;;  %s1598_s11 = sand.u32 1, %s1189_s22  }
 0x2f6   : > { %s757_s15 = scalar_lea.sflag [#allocation5], %s1598_s11  ;;  %s1117_s13 = scalar_lea.vmem %s770_s8, 16 }
 0x2f7   : > { %p1118_p0 = scmp.ne.s32.totalorder %s770_s8, %s1117_s13  ;;  %s1221_s16 = smov [#allocation6]  }
 0x2f8   : > { %s1121_s19 = sshll.u32 %s1221_s16, 4  ;;  %s1122_s19 = int_to_ptr.vmem [resolvable:$false] %s1121_s19 }
 0x2f9   : > { %p1119_p2 = pnand %p1118_p0, %p1307_p3  ;;  %s1123_s20 = scalar_lea.vmem %s1122_s19, 32 }
 0x2fa   : > { %p1124_p5 = scmp.lt.s32.totalorder %s770_s8, %s1122_s19  ;;  %p1125_p6 = scmp.lt.s32.totalorder %s1123_s20, %s1117_s13 }
 0x2fb   : > { %p1120_p4 = pneg %p1119_p2 }
 0x2fc   : > { %p1126_p7 = por %p1125_p6, %p1124_p5 }
 0x2fe   : > { %p1127_p8 = pnand %p1126_p7, %p1120_p4 }
 0x300   : > { %1130 = shalt.err (!%p1127_p8)
}
 0x301   : > { %s1131_s25 = scalar_lea.hbm %s767_s7, 16  ;;  %s1135_s14 = scalar_lea.hbm %s1577_s6, 32 }
 0x302   : > { %p1132_p11 = scmp.ne.s32.totalorder %s767_s7, %s1131_s25  ;;  %p1136_p10 = scmp.lt.s32.totalorder %s767_s7, %s1577_s6 }
 0x303   : > { %p1137_p13 = scmp.lt.s32.totalorder %s1135_s14, %s1131_s25 }
 0x304   : > { %p1133_p12 = pnand %p1132_p11, %p1307_p3 }
 0x305   : > { %p1138_p0 = por %p1137_p13, %p1136_p10 }
 0x306   : > { %p1134_p1 = pneg %p1133_p12 }
 0x308   : > { %p1139_p2 = pnand %p1138_p0, %p1134_p1 }
 0x30a   : > { %1142 = shalt.err (!%p1139_p2)
}
 0x30b   : > { %1000 = dma.vmem_to_hbm [thread:$0]  (%p1307_p3), %s770_s8, 16, %s767_s7, %s757_s15  }
 0x30c PF: > { %p1012_p4 = scmp.ge.s32.totalorder %s1213_s28, 2  ;;  %s781_s12 = sand.u32 1, %s1185_s21  }
 0x30d   : > { %s782_s4 = scalar_lea.sflag [#allocation5], %s781_s12 }
 0x30e   : > { %p1007_p5 = pnand %p1012_p4, %p1317_p9 }
 0x310   : > { %p1008_p6 = pneg %p1007_p5 }
 0x312   : > { %1180 = dma.done.wait (%p1008_p6), %s782_s4, 16  }
 0x313   : > { %1182 = vsyncadd (%p1008_p6), %s782_s4, 4294967280  ;;  %s20_s28 = sadd.s32 1, %s1213_s28   ;;  %s1600_s23 = sld [smem:[#allocation9_spill]] }
 0x314   : > { %p17_p7 = scmp.ge.s32.totalorder %s20_s28, 6   ;;  %s1601_s24 = sld [smem:[#allocation15_spill]] }
 0x315   : > { %s1602_s10 = sld [smem:[#allocation10_spill]]  ;;  %s1606_s21 = smov %s1189_s22 }
 0x316   : > { %s1603_s25 = sld [smem:[#allocation11_spill]] }
 0x317   : > { %s1604_s26 = sld [smem:[#allocation12_spill]]  ;;  %19 = sbr.rel (!%p17_p7) target bundleno = 8 (0x8), region = 101 }
 0x318   : > { %s1605_s27 = sld [smem:[#allocation13_spill]] }
 0x319   : > { %s1607_s22 = smov %s1600_s23 }
 0x31a   : > { %s1608_s23 = smov %s1601_s24 }
 0x31b   : > { %s1609_s24 = smov %s1602_s10 }
 0x31c   :  { %786 = vsyncpa [#allocation4], 1 }
 0x31d   :  { %788 = vsyncpa [#allocation4 + $0x1], 1 }
 0x31e   :  { %789 = vsyncpa [#allocation5], 1 }
 0x31f   :  { %791 = vsyncpa [#allocation5 + $0x1], 1 }

// kernel: tpu_custom_call.1
= control target key start
LH: loop header
LB: loop body
LE: loop exit
PB: predicated region body
PF: predicated region fallthrough
CT: control target
= control target key end

     0   :  { %s1571_s0 = inlined_call_operand.vmem [shape: bf16[2,8,256], index: 0, kind: input, shape index: {}]   ;;  %s1572_s1 = inlined_call_operand.vmem [shape: bf16[2,16,64], index: 1, kind: input, shape index: {}]   ;;  %s1573_s2 = inlined_call_operand.vmem [shape: bf16[2,32,16], index: 2, kind: input, shape index: {}]   ;;  %s1574_s3 = inlined_call_operand.vmem [shape: bf16[2,64,4], index: 3, kind: input, shape index: {}]   ;;  %s1575_s4 = inlined_call_operand.hbm [shape: f32[128,128], index: 4, kind: input, shape index: {}]   ;;  %s1576_s5 = inlined_call_operand.vmem [shape: f32[1,128], index: 5, kind: input, shape index: {}]   ;;  %s1577_s6 = inlined_call_operand.hbm [shape: f32[2,1,128], index: 6, kind: output, shape index: {}]  }
   0x1   :  { %1583 = sst [smem:[#allocation16_spill]] %s1575_s4 }
   0x2   :  { %11 = vsyncpa [#allocation4], 0 }
   0x3   :  { %12 = vsyncpa [#allocation5], 0 }
   0x4   :  { %14 = vsyncpa [#allocation5 + $0x1], 0  ;;  %s1257_s21 = smov 0   ;;  %s1259_s22 = smov 0  }
   0x5   :  { %s1261_s23 = smov 0   ;;  %s1263_s24 = smov 0  }
   0x6   :  { %s1265_s25 = smov 0   ;;  %s1267_s26 = smov 0  }
   0x7   :  { %s1269_s27 = smov 0   ;;  %s1271_s28 = smov 0  }
   0x8 LB: > { %1584 = sst [smem:[#allocation9_spill]] %s1193_s23  ;;  %s889_s29 = sadd.s32 4294967295, %s1213_s28   ;;  %s1213_s28 = sphi %s1271_s28, %s20_s28   ;;  %s1209_s27 = sphi %s1269_s27, %s1605_s27   ;;  %s1205_s26 = sphi %s1267_s26, %s1604_s26   ;;  %s1201_s25 = sphi %s1265_s25, %s1603_s25   ;;  %s1197_s24 = sphi %s1263_s24, %s1609_s24   ;;  %s1193_s23 = sphi %s1261_s23, %s1608_s23   ;;  %s1189_s22 = sphi %s1259_s22, %s1607_s22   ;;  %s1185_s21 = sphi %s1257_s21, %s1606_s21  }
   0x9   : > { %1585 = sst [smem:[#allocation10_spill]] %s1205_s26  ;;  %s890_s30 = sadd.s32 4294967294, %s1213_s28  }
   0xa   : > { %1586 = sst [smem:[#allocation11_spill]] %s1209_s27  ;;  %s29_s7 = sadd.s32 1, %s1205_s26 }
   0xb   : > { %s32_s8 = sadd.s32 1, %s1209_s27  ;;  %p30_p0 = scmp.ge.s32.totalorder %s29_s7, 2 }
   0xc   : > { %s187_s9 = sadd.s32 1, %s1193_s23  ;;  %p197_p1 = scmp.ne.s32.totalorder %s1193_s23, %s1189_s22 }
   0xd   : > { %p198_p2 = scmp.eq.s32.totalorder %s889_s29, 3  ;;  %s1611_s7 = smov (%p30_p0, %s29_s7), 0 }
   0xe   : > { %1587 = sst [smem:[#allocation12_spill]] %s1611_s7  ;;  %s1613_s8 = smov (!%p30_p0, %s32_s8), %s1209_s27 }
   0xf   : > { %p1307_p3 = por %p198_p2, %p197_p1  ;;  %p203_p4 = scmp.ne.s32.totalorder %s1189_s22, %s1185_s21 }
  0x10   : > { %p34_p5 = scmp.ge.s32.totalorder %s1613_s8, 2  ;;  %p204_p6 = scmp.eq.s32.totalorder %s890_s30, 3 }
  0x11   : > { %p891_p7 = scmp.ge.s32.totalorder %s1213_s28, 1  ;;  %p211_p8 = scmp.lt.s32.totalorder %s1213_s28, 5 }
  0x12   : > { %s1615_s8 = smov (%p34_p5, %s1613_s8), 0  ;;  %p1317_p9 = por %p204_p6, %p203_p4 }
  0x13   : > { %1589 = sst [smem:[#allocation13_spill]] %s1615_s8  ;;  %p1321_p10 = pnand %p891_p7, %p211_p8 }
  0x14   : > { %s1590_s11 = scalar_select %p1317_p9, 1, 0 }
  0x15   : > { %s184_s13 = ssub.s32 %s1209_s27, %s1615_s8  ;;  %p1002_p12 = pneg %p1321_p10 }
  0x16   : > { %1591 = sst [smem:[#allocation14_spill]] %s1590_s11  ;;  %p185_p11 = scmp.eq.s32.totalorder %s184_s13, 0 }
  0x17   : > { %p1329_p13 = scmp.eq.s32.totalorder %s889_s29, 0  ;;  %s1215_s16 = smov [#allocation3]  }
  0x18   : > { %s1334_s15 = scalar_select %p185_p11, %s1193_s23, %s187_s9  }
  0x19   : > { %s223_s17 = sshll.u32 %s1215_s16, 4  ;;  %p1338_p0 = pnand %p1329_p13, %p1002_p12  ;;  %s224_s17 = int_to_ptr.vmem [resolvable:$true] %s223_s17 }
  0x1a   : > { %1594 = sst [smem:[#allocation15_spill]] %s1334_s15  ;;  %s1102_s19 = scalar_lea.vmem %s224_s17, 2048 }
  0x1b   : > { %p1093_p1 = pneg %p1338_p0  ;;  %p1103_p2 = scmp.ne.s32.totalorder %s224_s17, %s1102_s19 }
  0x1c   : > { %p1110_p6 = scmp.lt.s32.totalorder %s224_s17, %s224_s17  ;;  %p1111_p7 = scmp.lt.s32.totalorder %s1102_s19, %s1102_s19 }
  0x1d   : > { %p1105_p4 = pnand %p1103_p2, %p1093_p1 }
  0x1e   : > { %p1112_p8 = por %p1111_p7, %p1110_p6 }
  0x1f   : > { %p1106_p5 = pneg %p1105_p4 }
  0x21   : > { %p1113_p11 = pnand %p1112_p8, %p1106_p5 }
  0x23   : > { %1116 = shalt.err (!%p1113_p11)
}
  0x24   : > { %s1216_s20 = smov 128   ;;  %s1217_s29 = smov 8  }
  0x25   : > { %s1596_s4 = sld [smem:[#allocation16_spill]] }
  0x27   : > { %277 = sbr.rel (%p1321_p10) target bundleno = 780 (0x30c), region = 44 }
  0x2b   : > { %1005 = dma.hbm_to_vmem [thread:$0]  (!%p1338_p0), %s1596_s4, 2048, %s224_s17, [#allocation4], %s1216_s20, %s1216_s20, %s1217_s29  }
  0x2c   : > { %1176 = dma.done.wait (%p1329_p13), [#allocation4], 2048  }
  0x2d   : > { %1178 = vsyncadd (%p1329_p13), [#allocation4], 4294965248  ;;  %p324_p12 = scmp.lt.s32.totalorder %s1201_s25, 1  ;;  %p326_p1 = scmp.lt.s32.totalorder %s1197_s24, 1 }
  0x2e   : > { %p904_p10 = scmp.ne.s32.totalorder %s1197_s24, 0 }
  0x2f   : > { %s325_s16 = scalar_select %p324_p12, %s1201_s25, 1 }
  0x30   : > { %s327_s17 = scalar_select %p326_p1, %s1197_s24, 1 }
  0x31   : > { %s896_s18 = sshll.u32 %s325_s16, 1  ;;  %s909_s12 = sshll.u32 %s325_s16, 3 }
  0x32   : > { %s329_s19 = sadd.s32 %s896_s18, %s327_s17  ;;  %s1363_s30 = scalar_lea.vmem %s1572_s1, %s909_s12 }
  0x33   : > { %s897_s14 = sshll.u32 %s329_s19, 2  ;;  %s910_s9 = sshll.u32 %s325_s16, 4 }
  0x34   : > { %s331_s7 = scalar_lea.vmem %s1571_s0, %s897_s14  ;;  %s1371_s26 = scalar_lea.vmem %s1573_s2, %s910_s9 }
  0x35   : > { %s911_s15 = sshll.u32 %s325_s16, 5  ;;  %s1597_s18 = sand.u32 1, %s1189_s22  }
  0x36   : > { %s1376_s17 = scalar_lea.vmem %s1574_s3, %s911_s15  ;;  %s1380_s12 = scalar_lea.vmem [#allocation6], %s1597_s18 }
  0x37   : > { %350 = sbr.rel (%p904_p10) target bundleno = 62 (0x3e), region = 52 }
  0x3c   : > { %vm351_vm0 = vcmask 7168   ;;  %v1218_v0 = vmov 0.0  }
  0x3d   : > { %352 = vst.msk [vmem:[#allocation2] sm:$0xff] %vm351_vm0, %v1218_v0 }
  0x3e PF: > { %v354_v1 = vld [vmem:[%s331_s7] sm:$0xf]  ;;  %vm383_vm1 = vcmask 7168   ;;  %p905_p13 = scmp.ne.s32.totalorder %s1197_s24, 1 }
  0x3f   : > { %v355_v2 = vunpack.c.l.bf16 %v354_v1 }
  0x41   : > { %v356_v3 = vrot.slane %v355_v2, 4  ;;  %v362_v4 = vmul.f32 %v355_v2, %v355_v2 }
  0x43   : > { %v357_v5 = vadd.f32 %v356_v3, %v355_v2  ;;  %v363_v6 = vrot.slane %v362_v4, 4 }
  0x44   : > { %v353_v26 = vld [vmem:[#allocation2] sm:$0xff] }
  0x45   : > { %v358_v7 = vrot.slane %v357_v5, 2  ;;  %v364_v8 = vadd.f32 %v363_v6, %v362_v4 }
  0x47   : > { %v359_v9 = vadd.f32 %v358_v7, %v357_v5  ;;  %v365_v10 = vrot.slane %v364_v8, 2 }
  0x49   : > { %v360_v11 = vrot.slane %v359_v9, 1  ;;  %v366_v12 = vadd.f32 %v365_v10, %v364_v8 }
  0x4b   : > { %v361_v13 = vadd.f32 %v360_v11, %v359_v9  ;;  %v367_v14 = vrot.slane %v366_v12, 1 }
  0x4d   : > { %v368_v15 = vadd.f32 %v367_v14, %v366_v12  ;;  %v369_v16 = vmul.f32 0.125, %v361_v13 }
  0x4f   : > { %v370_v17 = vmul.f32 0.125, %v368_v15  ;;  %v371_v18 = vmul.f32 %v369_v16, %v369_v16 }
  0x51   : > { %v372_v19 = vsub.f32 %v370_v17, %v371_v18 }
  0x53   : > { %v373_v20 = vadd.f32 1e-05, %v372_v19 }
  0x55   : > { %1083 = vrsqrt.f32 %v373_v20 }
  0x62   : > { %v1084_v21 = vpop.eup %1083 }
  0x63   : > { %v375_v22 = vmul.f32 %v1084_v21, %v355_v2  ;;  %v378_v23 = vmul.f32 %v1084_v21, %v369_v16 }
  0x65   : > { %376 = vadd.xlane.f32.xlu0 %v375_v22 }
  0x69   : > { %379 = vadd.xlane.f32.xlu0 %v378_v23 }
  0xee   : > { %v377_v24 = vpop.xlane.xlu0 %376 }
  0xf2   : > { %v380_v25 = vpop.xlane.xlu0 %379 }
  0xf3   : > { %v381_v27 = vsub.f32 %v377_v24, %v380_v25  ;;  %388 = sbr.rel (%p905_p13) target bundleno = 756 (0x2f4), region = 56 }
  0xf5   : > { %v382_v28 = vadd.f32 %v381_v27, %v353_v26 }
  0xf7   : > { %384 = vst.msk [vmem:[#allocation2] sm:$0xff] %vm383_vm1, %v382_v28 }
  0xf8   : > { %v913_v29 = vld [vmem:[%s1363_s30] sm:$0xff]   ;;  %vm395_vm2 = vcmask 523264   ;;  %v940_v31 = vld [vmem:[%s1371_s26 + $0x8] sm:$0xff]   ;;  %vm446_vm3 = vcmask 130048   ;;  %vm527_vm4 = vcmask 31744   ;;  %v942_v1 = vld [vmem:[%s1376_s17 + $0x10] sm:$0xff]  }
  0xf9   : > { %v917_v30 = vld [vmem:[%s1371_s26] sm:$0xff]   ;;  %v1387_v32 = vunpack.c.l.bf16 %v913_v29  ;;  %v1389_v33 = vunpack.c.h.bf16 %v913_v29  ;;  %v1396_v37 = vunpack.c.l.bf16 %v940_v31  ;;  %v1398_v38 = vunpack.c.h.bf16 %v940_v31  ;;  %v941_v56 = vld [vmem:[%s1376_s17 + $0x8] sm:$0xff]   ;;  %v943_v16 = vld [vmem:[%s1376_s17 + $0x18] sm:$0xff]  }
  0xfa   : > { %v1391_v34 = vunpack.c.l.bf16 %v917_v30  ;;  %v1393_v35 = vunpack.c.h.bf16 %v917_v30  ;;  %v925_v36 = vld [vmem:[%s1376_s17] sm:$0xff]   ;;  %v1435_v5 = vunpack.c.l.bf16 %v941_v56  ;;  %v1438_v11 = vunpack.c.h.bf16 %v941_v56 }
  0xfb   : > { %v1400_v39 = vunpack.c.l.bf16 %v925_v36  ;;  %v396_v40 = vsel %vm395_vm2, %v1387_v32, 0.0  ;;  %v397_v41 = vsel %vm395_vm2, %v1389_v33, 0.0  ;;  %v405_v42 = vmul.f32 %v1387_v32, %v1387_v32 }
  0xfc   : > { %v406_v43 = vmul.f32 %v1389_v33, %v1389_v33  ;;  %v398_v44 = vadd.f32 %v397_v41, %v396_v40  ;;  %v447_v45 = vsel %vm446_vm3, %v1391_v34, 0.0  ;;  %v448_v46 = vsel %vm446_vm3, %v1393_v35, 0.0 }
  0xfd   : > { %v450_v47 = vsel %vm446_vm3, %v1396_v37, 0.0  ;;  %v407_v48 = vsel %vm395_vm2, %v405_v42, 0.0  ;;  %v449_v50 = vadd.f32 %v448_v46, %v447_v45  ;;  %v452_v51 = vsel %vm446_vm3, %v1398_v38, 0.0 }
  0xfe   : > { %v408_v49 = vsel %vm395_vm2, %v406_v43, 0.0  ;;  %v399_v52 = vrot.slane %v398_v44, 4  ;;  %v460_v54 = vmul.f32 %v1391_v34, %v1391_v34  ;;  %v461_v55 = vmul.f32 %v1393_v35, %v1393_v35 }
  0xff   : > { %v409_v53 = vadd.f32 %v408_v49, %v407_v48  ;;  %v451_v57 = vadd.f32 %v450_v47, %v449_v50  ;;  %v462_v58 = vmul.f32 %v1396_v37, %v1396_v37  ;;  %v463_v59 = vmul.f32 %v1398_v38, %v1398_v38 }
 0x100   : > { %v1429_v60 = vunpack.c.h.bf16 %v925_v36  ;;  %v400_v61 = vadd.f32 %v399_v52, %v398_v44  ;;  %v464_v63 = vsel %vm446_vm3, %v460_v54, 0.0  ;;  %v465_v0 = vsel %vm446_vm3, %v461_v55, 0.0 }
 0x101   : > { %v410_v62 = vrot.slane %v409_v53, 4  ;;  %v453_v2 = vadd.f32 %v452_v51, %v451_v57  ;;  %v466_v3 = vadd.f32 %v465_v0, %v464_v63  ;;  %v467_v4 = vsel %vm446_vm3, %v462_v58, 0.0 }
 0x102   : > { %v401_v6 = vrot.slane %v400_v61, 2  ;;  %v469_v8 = vsel %vm446_vm3, %v463_v59, 0.0  ;;  %v1440_v12 = vunpack.c.l.bf16 %v942_v1  ;;  %v1442_v15 = vunpack.c.h.bf16 %v942_v1 }
 0x103   : > { %v411_v7 = vadd.f32 %v410_v62, %v409_v53  ;;  %v454_v9 = vrot.slane %v453_v2, 4  ;;  %v468_v10 = vadd.f32 %v467_v4, %v466_v3  ;;  %v528_v17 = vsel %vm527_vm4, %v1400_v39, 0.0 }
 0x104   : > { %v402_v13 = vadd.f32 %v401_v6, %v400_v61  ;;  %v529_v20 = vsel %vm527_vm4, %v1429_v60, 0.0  ;;  %v531_v21 = vsel %vm527_vm4, %v1435_v5, 0.0  ;;  %v1451_v27 = vunpack.c.l.bf16 %v943_v16 }
 0x105   : > { %v412_v14 = vrot.slane %v411_v7, 2  ;;  %v455_v18 = vadd.f32 %v454_v9, %v453_v2  ;;  %v470_v19 = vadd.f32 %v469_v8, %v468_v10  ;;  %v530_v24 = vadd.f32 %v529_v20, %v528_v17 }
 0x106   : > { %v403_v22 = vrot.slane %v402_v13, 1  ;;  %v533_v28 = vsel %vm527_vm4, %v1438_v11, 0.0  ;;  %v1455_v31 = vunpack.c.h.bf16 %v943_v16  ;;  %v535_v42 = vsel %vm527_vm4, %v1440_v12, 0.0 }
 0x107   : > { %v413_v23 = vadd.f32 %v412_v14, %v411_v7  ;;  %v456_v25 = vrot.slane %v455_v18, 2  ;;  %v471_v26 = vrot.slane %v470_v19, 4  ;;  %v532_v36 = vadd.f32 %v531_v21, %v530_v24 }
 0x108   : > { %v404_v29 = vadd.f32 %v403_v22, %v402_v13  ;;  %v537_v43 = vsel %vm527_vm4, %v1442_v15, 0.0  ;;  %v549_v47 = vmul.f32 %v1400_v39, %v1400_v39  ;;  %v550_v50 = vmul.f32 %v1429_v60, %v1429_v60 }
 0x109   : > { %v414_v30 = vrot.slane %v413_v23, 1  ;;  %v457_v40 = vadd.f32 %v456_v25, %v455_v18  ;;  %v472_v41 = vadd.f32 %v471_v26, %v470_v19  ;;  %v534_v46 = vadd.f32 %v533_v28, %v532_v36 }
 0x10a   : > { %v416_v45 = vmul.f32 0.0625, %v404_v29  ;;  %v551_v51 = vmul.f32 %v1435_v5, %v1435_v5  ;;  %v539_v55 = vsel %vm527_vm4, %v1451_v27, 0.0  ;;  %v541_v58 = vsel %vm527_vm4, %v1455_v31, 0.0 }
 0x10b   : > { %v415_v44 = vadd.f32 %v414_v30, %v413_v23  ;;  %v458_v48 = vrot.slane %v457_v40, 1  ;;  %v473_v49 = vrot.slane %v472_v41, 2  ;;  %v536_v54 = vadd.f32 %v535_v42, %v534_v46 }
 0x10c   : > { %v418_v53 = vmul.f32 %v416_v45, %v416_v45  ;;  %v552_v59 = vmul.f32 %v1438_v11, %v1438_v11  ;;  %v553_v63 = vmul.f32 %v1440_v12, %v1440_v12  ;;  %v557_v0 = vsel %vm527_vm4, %v549_v47, 0.0 }
 0x10d   : > { %v417_v52 = vmul.f32 0.0625, %v415_v44  ;;  %v459_v56 = vadd.f32 %v458_v48, %v457_v40  ;;  %v474_v57 = vadd.f32 %v473_v49, %v472_v41  ;;  %v538_v62 = vadd.f32 %v537_v43, %v536_v54 }
 0x10e   : > { %v558_v3 = vsel %vm527_vm4, %v550_v50, 0.0  ;;  %v560_v4 = vsel %vm527_vm4, %v551_v51, 0.0  ;;  %v554_v13 = vmul.f32 %v1442_v15, %v1442_v15  ;;  %v562_v14 = vsel %vm527_vm4, %v552_v59, 0.0 }
 0x10f   : > { %v419_v61 = vsub.f32 %v417_v52, %v418_v53  ;;  %v475_v1 = vrot.slane %v474_v57, 1  ;;  %v477_v2 = vmul.f32 0.03125, %v459_v56  ;;  %v540_v7 = vadd.f32 %v539_v55, %v538_v62 }
 0x110   : > { %v559_v8 = vadd.f32 %v558_v3, %v557_v0  ;;  %v555_v19 = vmul.f32 %v1451_v27, %v1451_v27  ;;  %v564_v20 = vsel %vm527_vm4, %v553_v63, 0.0  ;;  %v556_v24 = vmul.f32 %v1455_v31, %v1455_v31 }
 0x111   : > { %v420_v6 = vadd.f32 1e-05, %v419_v61  ;;  %v476_v9 = vadd.f32 %v475_v1, %v474_v57  ;;  %v479_v10 = vmul.f32 %v477_v2, %v477_v2  ;;  %v542_v16 = vadd.f32 %v541_v58, %v540_v7 }
 0x112   : > { %v561_v17 = vadd.f32 %v560_v4, %v559_v8  ;;  %v566_v25 = vsel %vm527_vm4, %v554_v13, 0.0  ;;  %v568_v30 = vsel %vm527_vm4, %v555_v19, 0.0  ;;  %v570_v41 = vsel %vm527_vm4, %v556_v24, 0.0 }
 0x113   : > { %1085 = vrsqrt.f32 %v420_v6  ;;  %v478_v18 = vmul.f32 0.03125, %v476_v9  ;;  %v543_v21 = vrot.slane %v542_v16, 4  ;;  %vm1220_vm5 = vmmov 0  }
 0x114   : > { %v563_v22 = vadd.f32 %v562_v14, %v561_v17 }
 0x115   : > { %v480_v23 = vsub.f32 %v478_v18, %v479_v10  ;;  %v544_v26 = vadd.f32 %v543_v21, %v542_v16 }
 0x116   : > { %v565_v28 = vadd.f32 %v564_v20, %v563_v22 }
 0x117   : > { %v481_v29 = vadd.f32 1e-05, %v480_v23  ;;  %v545_v36 = vrot.slane %v544_v26, 2 }
 0x118   : > { %v567_v40 = vadd.f32 %v566_v25, %v565_v28  ;;  %v651_v25 = vld [vmem:[#allocation3 + $0x78] sm:$0xff]  ;;  %v650_v28 = vld [vmem:[#allocation3 + $0x70] sm:$0xff] }
 0x119   : > { %1087 = vrsqrt.f32 %v481_v29  ;;  %v546_v42 = vadd.f32 %v545_v36, %v544_v26  ;;  %v1219_v26 = vmov 0.0   ;;  %v646_v29 = vld [vmem:[#allocation3 + $0x50] sm:$0xff]  ;;  %v644_v36 = vld [vmem:[#allocation3 + $0x40] sm:$0xff] }
 0x11a   : > { %v569_v43 = vadd.f32 %v568_v30, %v567_v40  ;;  %961 = vmatprep.subr.mxu0 %v1219_v26  ;;  %993 = vmatprep.mubr.msk.f32.mxu0 %vm1220_vm5, %v1219_v26  ;;  %v645_v30 = vld [vmem:[#allocation3 + $0x48] sm:$0xff]  ;;  %v389_v40 = vld [vmem:[#allocation2] sm:$0xff] }
 0x11b   : > { %v547_v44 = vrot.slane %v546_v42, 1  ;;  %962 = vmatpush3.msra.mxu0 %v651_v25 }
 0x11c   : > { %v571_v46 = vadd.f32 %v570_v41, %v569_v43  ;;  %963 = vmatprep.subr.mxu0 %v1219_v26  ;;  %v643_v41 = vld [vmem:[#allocation3 + $0x38] sm:$0xff]  ;;  %v642_v43 = vld [vmem:[#allocation3 + $0x30] sm:$0xff] }
 0x11d   : > { %v548_v49 = vadd.f32 %v547_v44, %v546_v42  ;;  %964 = vmatpush3.msra.mxu0 %v650_v28  ;;  %v390_v42 = vmul.f32 0.00390625, %v389_v40  ;;  %v641_v44 = vld [vmem:[#allocation3 + $0x28] sm:$0xff] }
 0x11e   : > { %v572_v47 = vrot.slane %v571_v46, 4  ;;  %965 = vmatprep.subr.mxu0 %v1219_v26 }
 0x11f   : > { %v578_v59 = vmul.f32 0.015625, %v548_v49  ;;  %v637_v49 = vld [vmem:[#allocation3 + $0x8] sm:$0xff] }
 0x120   : > { %v1086_v48 = vpop.eup %1085  ;;  %v573_v53 = vadd.f32 %v572_v47, %v571_v46  ;;  %v640_v46 = vld [vmem:[#allocation3 + $0x20] sm:$0xff]  ;;  %v639_v47 = vld [vmem:[#allocation3 + $0x18] sm:$0xff] }
 0x121   : > { %v423_v50 = vmul.f32 %v1086_v48, %v1389_v33  ;;  %v422_v51 = vmul.f32 %v1086_v48, %v1387_v32  ;;  %v430_v52 = vmul.f32 %v1086_v48, %v416_v45  ;;  %v580_v1 = vmul.f32 %v578_v59, %v578_v59  ;;  %v638_v48 = vld [vmem:[#allocation3 + $0x10] sm:$0xff] }
 0x122   : > { %v574_v56 = vrot.slane %v573_v53, 2 }
 0x123   : > { %v427_v54 = vsel %vm395_vm2, %v423_v50, 0.0  ;;  %v424_v55 = vsel %vm395_vm2, %v422_v51, 0.0  ;;  %v431_v57 = vsel %vm395_vm2, %v430_v52, 0.0  ;;  %v636_v50 = vld [vmem:[#allocation3] sm:$0xff] }
 0x124   : > { %428 = vadd.xlane.f32.xlu1 %v427_v54  ;;  %425 = vadd.xlane.f32.xlu0 %v424_v55  ;;  %v575_v58 = vadd.f32 %v574_v56, %v573_v53 }
 0x126   : > { %v1088_v61 = vpop.eup %1087  ;;  %v576_v62 = vrot.slane %v575_v58, 1 }
 0x127   : > { %v483_v63 = vmul.f32 %v1088_v61, %v1391_v34  ;;  %v484_v32 = vmul.f32 %v1088_v61, %v1393_v35  ;;  %v499_v33 = vmul.f32 %v1088_v61, %v477_v2  ;;  %v485_v45 = vmul.f32 %v1088_v61, %v1396_v37 }
 0x128   : > { %432 = vadd.xlane.f32.xlu0 %v431_v57  ;;  %v577_v0 = vadd.f32 %v576_v62, %v575_v58  ;;  %v486_v8 = vmul.f32 %v1088_v61, %v1398_v38 }
 0x129   : > { %v487_v3 = vsel %vm446_vm3, %v483_v63, 0.0  ;;  %v500_v4 = vsel %vm446_vm3, %v499_v33, 0.0  ;;  %v490_v7 = vsel %vm446_vm3, %v484_v32, 0.0  ;;  %v493_v34 = vsel %vm446_vm3, %v485_v45, 0.0 }
 0x12a   : > { %488 = vadd.xlane.f32.xlu1 %v487_v3  ;;  %v579_v6 = vmul.f32 0.015625, %v577_v0  ;;  %v496_v37 = vsel %vm446_vm3, %v486_v8, 0.0 }
 0x12c   : > { %501 = vadd.xlane.f32.xlu0 %v500_v4  ;;  %v581_v9 = vsub.f32 %v579_v6, %v580_v1 }
 0x12e   : > { %491 = vadd.xlane.f32.xlu1 %v490_v7  ;;  %v582_v35 = vadd.f32 1e-05, %v581_v9 }
 0x130   : > { %494 = vadd.xlane.f32.xlu0 %v493_v34  ;;  %1089 = vrsqrt.f32 %v582_v35 }
 0x132   : > { %497 = vadd.xlane.f32.xlu1 %v496_v37 }
 0x13d   : > { %v1090_v2 = vpop.eup %1089 }
 0x13e   : > { %v616_v10 = vmul.f32 %v1090_v2, %v578_v59  ;;  %v584_v13 = vmul.f32 %v1090_v2, %v1400_v39  ;;  %v586_v14 = vmul.f32 %v1090_v2, %v1435_v5  ;;  %v585_v16 = vmul.f32 %v1090_v2, %v1429_v60 }
 0x13f   : > { %v588_v20 = vmul.f32 %v1090_v2, %v1440_v12  ;;  %v587_v21 = vmul.f32 %v1090_v2, %v1438_v11  ;;  %v590_v5 = vmul.f32 %v1090_v2, %v1451_v27  ;;  %v589_v22 = vmul.f32 %v1090_v2, %v1442_v15  ;;  %v649_v15 = vld [vmem:[#allocation3 + $0x68] sm:$0xff]  ;;  %v648_v27 = vld [vmem:[#allocation3 + $0x60] sm:$0xff] }
 0x140   : > { %v617_v38 = vsel %vm527_vm4, %v616_v10, 0.0  ;;  %v592_v17 = vsel %vm527_vm4, %v584_v13, 0.0  ;;  %v598_v18 = vsel %vm527_vm4, %v586_v14, 0.0  ;;  %v595_v19 = vsel %vm527_vm4, %v585_v16, 0.0  ;;  %966 = vmatpush3.msra.mxu0 %v649_v15 }
 0x141   : > { %618 = vadd.xlane.f32.xlu1 %v617_v38  ;;  %593 = vadd.xlane.f32.xlu0 %v592_v17  ;;  %v604_v39 = vsel %vm527_vm4, %v588_v20, 0.0  ;;  %v601_v60 = vsel %vm527_vm4, %v587_v21, 0.0  ;;  %v610_v23 = vsel %vm527_vm4, %v590_v5, 0.0  ;;  %v607_v24 = vsel %vm527_vm4, %v589_v22, 0.0 }
 0x142   : > { %v591_v12 = vmul.f32 %v1090_v2, %v1455_v31  ;;  %967 = vmatprep.subr.mxu0 %v1219_v26  ;;  %v647_v31 = vld [vmem:[#allocation3 + $0x58] sm:$0xff] }
 0x143   : > { %968 = vmatpush3.msra.mxu0 %v648_v27 }
 0x144   : > { %v613_v11 = vsel %vm527_vm4, %v591_v12, 0.0  ;;  %969 = vmatprep.subr.mxu0 %v1219_v26 }
 0x145   : > { %599 = vadd.xlane.f32.xlu1 %v598_v18  ;;  %596 = vadd.xlane.f32.xlu0 %v595_v19 }
 0x146   : > { %970 = vmatpush3.msra.mxu0 %v647_v31 }
 0x147   : > { %971 = vmatprep.subr.mxu0 %v1219_v26 }
 0x148   : > { %972 = vmatpush3.msra.mxu0 %v646_v29 }
 0x149   : > { %605 = vadd.xlane.f32.xlu1 %v604_v39  ;;  %602 = vadd.xlane.f32.xlu0 %v601_v60 }
 0x14a   : > { %973 = vmatprep.subr.mxu0 %v1219_v26 }
 0x14b   : > { %974 = vmatpush3.msra.mxu0 %v645_v30 }
 0x14c   : > { %975 = vmatprep.subr.mxu0 %v1219_v26 }
 0x14d   : > { %611 = vadd.xlane.f32.xlu1 %v610_v23  ;;  %608 = vadd.xlane.f32.xlu0 %v607_v24 }
 0x14e   : > { %976 = vmatpush3.msra.mxu0 %v644_v36 }
 0x14f   : > { %977 = vmatprep.subr.mxu0 %v1219_v26 }
 0x150   : > { %978 = vmatpush3.msra.mxu0 %v643_v41 }
 0x151   : > { %614 = vadd.xlane.f32.xlu0 %v613_v11  ;;  %979 = vmatprep.subr.mxu0 %v1219_v26 }
 0x152   : > { %980 = vmatpush3.msra.mxu0 %v642_v43 }
 0x153   : > { %981 = vmatprep.subr.mxu0 %v1219_v26 }
 0x154   : > { %982 = vmatpush3.msra.mxu0 %v641_v44 }
 0x155   : > { %983 = vmatprep.subr.mxu0 %v1219_v26 }
 0x156   : > { %984 = vmatpush3.msra.mxu0 %v640_v46 }
 0x157   : > { %985 = vmatprep.subr.mxu0 %v1219_v26 }
 0x158   : > { %986 = vmatpush3.msra.mxu0 %v639_v47 }
 0x159   : > { %987 = vmatprep.subr.mxu0 %v1219_v26 }
 0x15a   : > { %988 = vmatpush3.msra.mxu0 %v638_v48 }
 0x15b   : > { %989 = vmatprep.subr.mxu0 %v1219_v26 }
 0x15c   : > { %990 = vmatpush3.msra.mxu0 %v637_v49 }
 0x15d   : > { %991 = vmatprep.subr.mxu0 %v1219_v26  ;;  %v652_v26 = vld [vmem:[%s1576_s5] sm:$0x1] }
 0x15e   : > { %992 = vmatpush3.msra.mxu0 %v636_v50 }
 0x180   : > { %653 = vxpose.xlu1.b32.start [1/15] (short) (narrow) %v390_v42, 8 }
 0x1ad   : > { %v426_v51 = vpop.xlane.xlu0 %425  ;;  %v429_v52 = vpop.xlane.xlu1 %428 }
 0x1b1   : > { %v433_v53 = vpop.xlane.xlu0 %432 }
 0x1b2   : > { %v434_v54 = vsub.f32 %v426_v51, %v433_v53  ;;  %v435_v55 = vsub.f32 %v429_v52, %v433_v53 }
 0x1b3   : > { %v489_v57 = vpop.xlane.xlu1 %488 }
 0x1b4   : > { %v436_v56 = vmul.f32 0.015625, %v434_v54  ;;  %v437_v61 = vmul.f32 0.015625, %v435_v55 }
 0x1b5   : > { %v502_v58 = vpop.xlane.xlu0 %501 }
 0x1b6   : > { %654 = vxpose.xlu1.b32.cont [2/15] (short) (narrow) %v436_v56, 8  ;;  %v503_v59 = vsub.f32 %v489_v57, %v502_v58 }
 0x1b7   : > { %v492_v63 = vpop.xlane.xlu1 %491 }
 0x1b8   : > { %v507_v62 = vmul.f32 0.0625, %v503_v59  ;;  %v504_v32 = vsub.f32 %v492_v63, %v502_v58 }
 0x1b9   : > { %v495_v33 = vpop.xlane.xlu0 %494 }
 0x1ba   : > { %655 = vxpose.xlu1.b32.cont [3/15] (short) (narrow) %v437_v61, 8  ;;  %v505_v45 = vsub.f32 %v495_v33, %v502_v58  ;;  %v508_v0 = vmul.f32 0.0625, %v504_v32 }
 0x1bb   : > { %v498_v1 = vpop.xlane.xlu1 %497 }
 0x1bc   : > { %v506_v3 = vsub.f32 %v498_v1, %v502_v58  ;;  %v509_v4 = vmul.f32 0.0625, %v505_v45 }
 0x1be   : > { %656 = vxpose.xlu1.b32.cont [4/15] (short) (narrow) %v507_v62, 8  ;;  %v510_v6 = vmul.f32 0.0625, %v506_v3 }
 0x1c2   : > { %657 = vxpose.xlu1.b32.cont [5/15] (short) (narrow) %v508_v0, 8 }
 0x1c6   : > { %658 = vxpose.xlu1.b32.cont [6/15] (short) (narrow) %v509_v4, 8 }
 0x1ca   : > { %659 = vxpose.xlu1.b32.cont [7/15] (short) (narrow) %v510_v6, 8  ;;  %v619_v7 = vpop.xlane.xlu1 %618  ;;  %v594_v8 = vpop.xlane.xlu0 %593 }
 0x1cb   : > { %v620_v34 = vsub.f32 %v594_v8, %v619_v7 }
 0x1cd   : > { %v628_v9 = vmul.f32 0.25, %v620_v34 }
 0x1ce   : > { %v597_v35 = vpop.xlane.xlu0 %596  ;;  %v600_v2 = vpop.xlane.xlu1 %599 }
 0x1cf   : > { %v621_v37 = vsub.f32 %v597_v35, %v619_v7  ;;  %660 = vxpose.xlu1.b32.cont [8/15] (short) (narrow) %v628_v9, 8  ;;  %v622_v10 = vsub.f32 %v600_v2, %v619_v7 }
 0x1d1   : > { %v629_v13 = vmul.f32 0.25, %v621_v37  ;;  %v630_v16 = vmul.f32 0.25, %v622_v10 }
 0x1d2   : > { %v603_v14 = vpop.xlane.xlu0 %602  ;;  %v606_v17 = vpop.xlane.xlu1 %605 }
 0x1d3   : > { %661 = vxpose.xlu1.b32.cont [9/15] (short) (narrow) %v629_v13, 8  ;;  %v623_v38 = vsub.f32 %v603_v14, %v619_v7  ;;  %v624_v18 = vsub.f32 %v606_v17, %v619_v7 }
 0x1d5   : > { %v631_v19 = vmul.f32 0.25, %v623_v38  ;;  %v632_v21 = vmul.f32 0.25, %v624_v18 }
 0x1d6   : > { %v609_v20 = vpop.xlane.xlu0 %608  ;;  %v612_v60 = vpop.xlane.xlu1 %611 }
 0x1d7   : > { %662 = vxpose.xlu1.b32.cont [10/15] (short) (narrow) %v630_v16, 8  ;;  %v625_v39 = vsub.f32 %v609_v20, %v619_v7  ;;  %v626_v5 = vsub.f32 %v612_v60, %v619_v7 }
 0x1d9   : > { %v633_v22 = vmul.f32 0.25, %v625_v39  ;;  %v634_v24 = vmul.f32 0.25, %v626_v5 }
 0x1da   : > { %v615_v23 = vpop.xlane.xlu0 %614 }
 0x1db   : > { %663 = vxpose.xlu1.b32.cont [11/15] (short) (narrow) %v631_v19, 8  ;;  %v627_v12 = vsub.f32 %v615_v23, %v619_v7 }
 0x1dd   : > { %v635_v11 = vmul.f32 0.25, %v627_v12 }
 0x1df   : > { %664 = vxpose.xlu1.b32.cont [12/15] (short) (narrow) %v632_v21, 8 }
 0x1e3   : > { %665 = vxpose.xlu1.b32.cont [13/15] (short) (narrow) %v633_v22, 8 }
 0x1e7   : > { %666 = vxpose.xlu1.b32.cont [14/15] (short) (narrow) %v634_v24, 8 }
 0x1eb   : > { %667 = vxpose.xlu1.b32.end [15/15] (short) (narrow) %v635_v11, 8 }
 0x22f   : > { %v669_v25 = vpop.trf.xlu1 }
 0x230   : > { %994 = vmatmul.mubr.f32.vlgmr.msra.gmra.mxu0 %v669_v25 }
 0x2f0   : > { %v751_v28 = vpop.f32.mrf.mxu0 }
 0x2f1   : > { %v752_v15 = vadd.f32 %v751_v28, %v652_v26 }
 0x2f2   : > { %v995_v27 = vpop.f32.mrf.mxu0 }
 0x2f3   : > { %755 = vst [vmem:[%s1380_s12] sm:$0x1] %v752_v15 }
 0x2f4 PF: > { %s906_s24 = sshll.u32 %s1201_s25, 4  ;;  %s769_s8 = sshll.u32 %s1380_s12, 4  ;;  %s770_s8 = int_to_ptr.vmem [resolvable:$true] %s769_s8 }
 0x2f5   : > { %s767_s7 = scalar_lea.hbm %s1577_s6, %s906_s24  ;;  %s1598_s11 = sand.u32 1, %s1189_s22  }
 0x2f6   : > { %s757_s15 = scalar_lea.sflag [#allocation5], %s1598_s11  ;;  %s1117_s13 = scalar_lea.vmem %s770_s8, 16 }
 0x2f7   : > { %p1118_p0 = scmp.ne.s32.totalorder %s770_s8, %s1117_s13  ;;  %s1221_s16 = smov [#allocation6]  }
 0x2f8   : > { %s1121_s19 = sshll.u32 %s1221_s16, 4  ;;  %s1122_s19 = int_to_ptr.vmem [resolvable:$false] %s1121_s19 }
 0x2f9   : > { %p1119_p2 = pnand %p1118_p0, %p1307_p3  ;;  %s1123_s20 = scalar_lea.vmem %s1122_s19, 32 }
 0x2fa   : > { %p1124_p5 = scmp.lt.s32.totalorder %s770_s8, %s1122_s19  ;;  %p1125_p6 = scmp.lt.s32.totalorder %s1123_s20, %s1117_s13 }
 0x2fb   : > { %p1120_p4 = pneg %p1119_p2 }
 0x2fc   : > { %p1126_p7 = por %p1125_p6, %p1124_p5 }
 0x2fe   : > { %p1127_p8 = pnand %p1126_p7, %p1120_p4 }
 0x300   : > { %1130 = shalt.err (!%p1127_p8)
}
 0x301   : > { %s1131_s25 = scalar_lea.hbm %s767_s7, 16  ;;  %s1135_s14 = scalar_lea.hbm %s1577_s6, 32 }
 0x302   : > { %p1132_p11 = scmp.ne.s32.totalorder %s767_s7, %s1131_s25  ;;  %p1136_p10 = scmp.lt.s32.totalorder %s767_s7, %s1577_s6 }
 0x303   : > { %p1137_p13 = scmp.lt.s32.totalorder %s1135_s14, %s1131_s25 }
 0x304   : > { %p1133_p12 = pnand %p1132_p11, %p1307_p3 }
 0x305   : > { %p1138_p0 = por %p1137_p13, %p1136_p10 }
 0x306   : > { %p1134_p1 = pneg %p1133_p12 }
 0x308   : > { %p1139_p2 = pnand %p1138_p0, %p1134_p1 }
 0x30a   : > { %1142 = shalt.err (!%p1139_p2)
}
 0x30b   : > { %1000 = dma.vmem_to_hbm [thread:$0]  (%p1307_p3), %s770_s8, 16, %s767_s7, %s757_s15  }
 0x30c PF: > { %p1012_p4 = scmp.ge.s32.totalorder %s1213_s28, 2  ;;  %s781_s12 = sand.u32 1, %s1185_s21  }
 0x30d   : > { %s782_s4 = scalar_lea.sflag [#allocation5], %s781_s12 }
 0x30e   : > { %p1007_p5 = pnand %p1012_p4, %p1317_p9 }
 0x310   : > { %p1008_p6 = pneg %p1007_p5 }
 0x312   : > { %1180 = dma.done.wait (%p1008_p6), %s782_s4, 16  }
 0x313   : > { %1182 = vsyncadd (%p1008_p6), %s782_s4, 4294967280  ;;  %s20_s28 = sadd.s32 1, %s1213_s28   ;;  %s1600_s23 = sld [smem:[#allocation9_spill]] }
 0x314   : > { %p17_p7 = scmp.ge.s32.totalorder %s20_s28, 6   ;;  %s1601_s24 = sld [smem:[#allocation15_spill]] }
 0x315   : > { %s1602_s10 = sld [smem:[#allocation10_spill]]  ;;  %s1606_s21 = smov %s1189_s22 }
 0x316   : > { %s1603_s25 = sld [smem:[#allocation11_spill]] }
 0x317   : > { %s1604_s26 = sld [smem:[#allocation12_spill]]  ;;  %19 = sbr.rel (!%p17_p7) target bundleno = 8 (0x8), region = 101 }
 0x318   : > { %s1605_s27 = sld [smem:[#allocation13_spill]] }
 0x319   : > { %s1607_s22 = smov %s1600_s23 }
 0x31a   : > { %s1608_s23 = smov %s1601_s24 }
 0x31b   : > { %s1609_s24 = smov %s1602_s10 }
 0x31c   :  { %786 = vsyncpa [#allocation4], 1 }
 0x31d   :  { %788 = vsyncpa [#allocation4 + $0x1], 1 }
 0x31e   :  { %789 = vsyncpa [#allocation5], 1 }
 0x31f   :  { %791 = vsyncpa [#allocation5 + $0x1], 1 }

</bundles_post_ra>
